<compile_context>
chip_gen: v7x
topology: tpu7x:2x2x1
jax: 0.10.0
libtpu: 0.0.40
codegen_flags: <defaults>
</compile_context>

<pallas_src>
import math
import jax
import jax.numpy as jnp
from jax.experimental import pallas as pl
from jax.experimental.pallas import tpu as pltpu

# ----------------------- small synthetic LED config -----------------------
LAYER_EMB_DIM = 32      # layer_embedding_dim
PROMPT_LENGTH = 4       # prompt_length
VOCAB_SIZE    = 64      # vocab_size (after resize_token_embeddings)
D_MODEL       = 32      # led.config.d_model
NUM_HEADS     = 4
HEAD_DIM      = D_MODEL // NUM_HEADS
FFN_DIM       = 64
NUM_LAYERS    = 2
MAX_LENGTH    = 64      # decoder position table size (module max_length analogue)
TRUNC_LEN     = 1014    # LED truncation of decoder_input_embeds
NEG_INF       = -1e9
LN_EPS        = 1e-5
LANE          = 128
VOCAB_PAD     = ((VOCAB_SIZE + LANE - 1) // LANE) * LANE   # lane-dense LM-head width


# ------------------------------ fused kernel -------------------------------
def _led_decoder_kernel(lat_ref, ids_ref, pwr_ref, emb_ref, pos_ref, gvec_ref,
                        wA_ref, wB_ref, lvec_ref, o_ref):
    """Whole LED-style decoder forward for one batch element; VMEM-resident."""
    f32 = jnp.float32
    D = D_MODEL
    T = pos_ref.shape[0]

    def layer_norm(y, g, b):
        mu = jnp.mean(y, axis=-1, keepdims=True)
        var = jnp.mean((y - mu) ** 2, axis=-1, keepdims=True)
        return (y - mu) * jax.lax.rsqrt(var + LN_EPS) * g + b

    gv = gvec_ref[...]                 # (4, 128) global vector slab
    ln_emb_g = gv[0:1, :D]
    ln_emb_b = gv[1:2, :D]
    lm_bias = gv[2:3, :]               # final_logits_bias padded to 128 lanes

    # ---- fused input-embedding assembly (was JAX glue + a second kernel) ----
    lat = lat_ref[0]                                           # (1, E)
    prefix_rows = [jnp.dot(lat, pwr_ref[p], preferred_element_type=f32)
                   for p in range(PROMPT_LENGTH)]              # P x (1, D)

    ids = ids_ref[0]                                           # (L_tok, 1) int32
    L_tok = ids.shape[0]
    vocab_iota = jax.lax.broadcasted_iota(jnp.int32, (L_tok, VOCAB_PAD), 1)
    onehot = (ids == vocab_iota).astype(f32)                   # exact gather as MXU matmul
    emb = emb_ref[...]                                         # (VOCAB_PAD, D)
    tok = jnp.dot(onehot, emb, preferred_element_type=f32)     # (L_tok, D)

    # prefix bias already folded into pos_ref rows [0:P) at pack time
    x = jnp.concatenate(prefix_rows + [tok], axis=0) + pos_ref[...]   # (T, D)
    h = layer_norm(x, ln_emb_g, ln_emb_b)

    # causal mask as an in-place select (padding mask is all-ones -> dropped)
    row = jax.lax.broadcasted_iota(jnp.int32, (T, T), 0)
    col = jax.lax.broadcasted_iota(jnp.int32, (T, T), 1)
    causal_ok = col <= row

    for l in range(NUM_LAYERS):
        WQKV = wA_ref[l, 0]            # (D, 128) packed QKV, zero-padded 96->128
        FC1 = wA_ref[l, 1]             # (D, 128) fc1, zero-padded 64->128
        WO = wB_ref[l, 0]              # (128, D) self-attn out-proj (rows >= D zero)
        FC2 = wB_ref[l, 1]             # (128, D) fc2, zero-padded rows 64->128
        LV = lvec_ref[l]               # (12, 128) all per-layer vectors
        bqkv = LV[0:1, :]
        bo = LV[1:2, :D]
        cross_const = LV[2:3, :D]      # precomputed b_v @ W_o + b_o (exact)
        fc1_b = LV[3:4, :]
        fc2_b = LV[4:5, :D]
        lsg, lsb = LV[5:6, :D], LV[6:7, :D]
        lcg, lcb = LV[7:8, :D], LV[8:9, :D]
        lfg, lfb = LV[9:10, :D], LV[10:11, :D]

        # ---- self-attention: one lane-dense packed QKV matmul (scale in Q) ----
        qkv = jnp.dot(h, WQKV, preferred_element_type=f32) + bqkv     # (T, 128)
        attn = bo                                                     # (1, D) -> broadcast
        # TODO(synk): at real LED sizes batch the heads through one dot_general
        # (H,T,T) instead of this unrolled per-head loop.
        for hh in range(NUM_HEADS):
            lo = hh * HEAD_DIM
            qh = qkv[:, lo:lo + HEAD_DIM]
            kh = qkv[:, D + lo:D + lo + HEAD_DIM]
            vh = qkv[:, 2 * D + lo:2 * D + lo + HEAD_DIM]
            s = jax.lax.dot_general(qh, kh, (((1,), (1,)), ((), ())),
                                    preferred_element_type=f32)       # (T, T)
            s = jnp.where(causal_ok, s, NEG_INF)
            s = s - jnp.max(s, axis=-1, keepdims=True)
            p = jnp.exp(s)
            p = p * pl.reciprocal(jnp.sum(p, axis=-1, keepdims=True), approx=True)
            ctx = jnp.dot(p, vh, preferred_element_type=f32)          # (T, hd)
            attn = attn + jnp.dot(ctx, WO[lo:lo + HEAD_DIM, :],
                                  preferred_element_type=f32)
        h = layer_norm(h + attn, lsg, lsb)

        # ---- cross-attention to the all-zero 1-token encoder output ----
        # k = b_k, v = b_v and softmax over a single key is 1, so the block
        # output is the constant row (b_v @ W_o + b_o): precomputed at pack time.
        h = layer_norm(h + cross_const, lcg, lcb)

        # ---- FFN (lane-dense 128-wide, zero pads are exact) ----
        f = jnp.dot(h, FC1, preferred_element_type=f32) + fc1_b
        # TODO(synk): HF LED 'gelu' is erf-based; tanh approximation used here.
        f = jax.nn.gelu(f, approximate=True)
        f = jnp.dot(f, FC2, preferred_element_type=f32) + fc2_b
        h = layer_norm(h + f, lfg, lfb)

    # ---- weight-tied LM head, only for non-prefix positions; 128-lane store ----
    h_tail = h[PROMPT_LENGTH:, :]                                     # (L_tok, D)
    logits = jax.lax.dot_general(h_tail, emb, (((1,), (1,)), ((), ())),
                                 preferred_element_type=f32) + lm_bias
    o_ref[0] = logits.astype(o_ref.dtype)


# --------------------------- weight packing (glue) --------------------------
def _pack_weights(params, T):
    """Pack all decoder weights into 7 lane-dense slabs (done once, outside kernel)."""
    scale = 1.0 / math.sqrt(HEAD_DIM)
    Ls = params["layers"]
    D = D_MODEL
    W = LANE

    def padrow(v):
        return jnp.pad(v, (0, W - v.shape[0]))

    # prefix projection restructured so each prompt row is a separate (E, D) matmul
    pwr = params["prefix_w"].reshape(LAYER_EMB_DIM, PROMPT_LENGTH, D).transpose(1, 0, 2)

    # token-embedding / weight-tied LM-head slab, vocab zero-padded to 128 rows
    emb_pad = jnp.pad(params["embed_tokens"], ((0, VOCAB_PAD - VOCAB_SIZE), (0, 0)))

    # positions for the concatenated sequence, prefix bias folded into rows [0:P)
    # NOTE: embed_pos only has MAX_LENGTH rows; T must stay <= MAX_LENGTH here.
    pos = params["embed_pos"][:T]
    pos = pos.at[:PROMPT_LENGTH].add(params["prefix_b"].reshape(PROMPT_LENGTH, D))

    gvec = jnp.stack([
        padrow(params["ln_emb_g"]),
        padrow(params["ln_emb_b"]),
        padrow(params["final_logits_bias"]),
        jnp.zeros((W,), jnp.float32),
    ])                                                                  # (4, 128)

    matsA, matsB, lvec = [], [], []
    for L in Ls:
        wqkv = jnp.concatenate([L["self_wq"] * scale, L["self_wk"], L["self_wv"]], axis=1)
        wqkv = jnp.pad(wqkv, ((0, 0), (0, W - 3 * D)))                  # (D, 128)
        fc1 = jnp.pad(L["fc1_w"], ((0, 0), (0, W - FFN_DIM)))           # (D, 128)
        matsA.append(jnp.stack([wqkv, fc1]))                            # (2, D, 128)

        wo_pad = jnp.pad(L["self_wo"], ((0, W - D), (0, 0)))            # (128, D)
        fc2 = jnp.pad(L["fc2_w"], ((0, W - FFN_DIM), (0, 0)))           # (128, D)
        matsB.append(jnp.stack([wo_pad, fc2]))                          # (2, 128, D)

        bqkv = jnp.concatenate([L["self_bq"] * scale, L["self_bk"], L["self_bv"]])
        cross_const = L["cross_bv"] @ L["cross_wo"] + L["cross_bo"]     # exact degenerate cross-attn
        lvec.append(jnp.stack([
            padrow(bqkv), padrow(L["self_bo"]), padrow(cross_const),
            padrow(L["fc1_b"]), padrow(L["fc2_b"]),
            padrow(L["ln_self_g"]), padrow(L["ln_self_b"]),
            padrow(L["ln_cross_g"]), padrow(L["ln_cross_b"]),
            padrow(L["ln_final_g"]), padrow(L["ln_final_b"]),
            jnp.zeros((W,), jnp.float32),
        ]))                                                             # (12, 128)

    return dict(pwr=pwr, emb_pad=emb_pad, pos=pos, gvec=gvec,
                matsA=jnp.stack(matsA), matsB=jnp.stack(matsB), lvec=jnp.stack(lvec))


# ------------------------------ Pallas forward ------------------------------
def forward_pallas(params, layer_latent, input_ids):
    """Teacher-forcing branch of LayerDecoderLED.forward: ONE fused pallas_call."""
    if input_ids.ndim > 2:
        input_ids = jnp.squeeze(input_ids, axis=1)
    input_ids = input_ids[:, :TRUNC_LEN]
    B, L_tok = input_ids.shape
    T = PROMPT_LENGTH + L_tok

    w = _pack_weights(params, T)
    lat3 = layer_latent.reshape(B, 1, LAYER_EMB_DIM).astype(jnp.float32)
    ids3 = input_ids.astype(jnp.int32).reshape(B, L_tok, 1)

    map2 = lambda b: (0, 0)
    map3 = lambda b: (0, 0, 0)
    map4 = lambda b: (0, 0, 0, 0)

    grid_spec = pltpu.PrefetchScalarGridSpec(
        num_scalar_prefetch=0,
        grid=(B,),
        in_specs=[
            pl.BlockSpec((1, 1, LAYER_EMB_DIM), lambda b: (b, 0, 0)),   # layer_latent
            pl.BlockSpec((1, L_tok, 1), lambda b: (b, 0, 0)),           # input_ids
            pl.BlockSpec(w["pwr"].shape, map3),
            pl.BlockSpec(w["emb_pad"].shape, map2),
            pl.BlockSpec(w["pos"].shape, map2),
            pl.BlockSpec(w["gvec"].shape, map2),
            pl.BlockSpec(w["matsA"].shape, map4),
            pl.BlockSpec(w["matsB"].shape, map4),
            pl.BlockSpec(w["lvec"].shape, map3),
        ],
        out_specs=pl.BlockSpec((1, L_tok, VOCAB_PAD), lambda b: (b, 0, 0)),
    )

    logits = pl.pallas_call(
        _led_decoder_kernel,
        out_shape=jax.ShapeDtypeStruct((B, L_tok, VOCAB_PAD), jnp.float32),
        grid_spec=grid_spec,
        compiler_params=pltpu.CompilerParams(dimension_semantics=("parallel",)),
    )(lat3, ids3, w["pwr"], w["emb_pad"], w["pos"], w["gvec"],
      w["matsA"], w["matsB"], w["lvec"])

    # prefix positions were never computed/stored; only drop the vocab lane pad
    return logits[:, :, :VOCAB_SIZE]
    # TODO(synk): generate() inference branch (autoregressive decoding) not implemented.


# ------------------------- pure-JAX reference forward -----------------------
def _ln_ref(x, g, b):
    mu = x.mean(-1, keepdims=True)
    var = ((x - mu) ** 2).mean(-1, keepdims=True)
    return (x - mu) * jax.lax.rsqrt(var + LN_EPS) * g + b


def _mha_ref(x, kv, mask, L, name):
    B, T, D = x.shape
    S = kv.shape[1]
    q = (x @ L[f"{name}_wq"] + L[f"{name}_bq"]).reshape(B, T, NUM_HEADS, HEAD_DIM).transpose(0, 2, 1, 3)
    k = (kv @ L[f"{name}_wk"] + L[f"{name}_bk"]).reshape(B, S, NUM_HEADS, HEAD_DIM).transpose(0, 2, 1, 3)
    v = (kv @ L[f"{name}_wv"] + L[f"{name}_bv"]).reshape(B, S, NUM_HEADS, HEAD_DIM).transpose(0, 2, 1, 3)
    s = jnp.einsum("bhtd,bhsd->bhts", q, k) / math.sqrt(HEAD_DIM) + mask
    p = jax.nn.softmax(s, axis=-1)
    o = jnp.einsum("bhts,bhsd->bhtd", p, v).transpose(0, 2, 1, 3).reshape(B, T, D)
    return o @ L[f"{name}_wo"] + L[f"{name}_bo"]


def forward_ref(params, layer_latent, input_ids):
    if input_ids.ndim > 2:
        input_ids = jnp.squeeze(input_ids, axis=1)
    B = layer_latent.shape[0]
    prefix = (layer_latent @ params["prefix_w"] + params["prefix_b"]).reshape(
        B, PROMPT_LENGTH, D_MODEL)
    tok_emb = jnp.take(params["embed_tokens"], input_ids, axis=0)[:, :TRUNC_LEN, :]
    x = jnp.concatenate([prefix, tok_emb], axis=1)
    T = x.shape[1]

    h = x + params["embed_pos"][:T][None, :, :]
    h = _ln_ref(h, params["ln_emb_g"], params["ln_emb_b"])

    attn_mask = jnp.ones((B, T), jnp.float32)
    causal = jnp.where(jnp.tril(jnp.ones((T, T), bool)), 0.0, NEG_INF).astype(jnp.float32)
    pad = (1.0 - attn_mask)[:, None, None, :] * NEG_INF
    self_mask = causal[None, None, :, :] + pad
    enc_h = jnp.zeros((B, 1, D_MODEL), jnp.float32)
    cross_mask = jnp.zeros((B, 1, T, 1), jnp.float32)

    for L in params["layers"]:
        h = _ln_ref(h + _mha_ref(h, h, self_mask, L, "self"), L["ln_self_g"], L["ln_self_b"])
        h = _ln_ref(h + _mha_ref(h, enc_h, cross_mask, L, "cross"), L["ln_cross_g"], L["ln_cross_b"])
        f = jax.nn.gelu(h @ L["fc1_w"] + L["fc1_b"], approximate=True)
        f = f @ L["fc2_w"] + L["fc2_b"]
        h = _ln_ref(h + f, L["ln_final_g"], L["ln_final_b"])

    logits = h @ params["embed_tokens"].T + params["final_logits_bias"]
    return logits[:, PROMPT_LENGTH:, :]


# ------------------------------ parameters --------------------------------
def init_params(key):
    def nrm(k, shape, scale=0.02):
        return scale * jax.random.normal(k, shape, dtype=jnp.float32)

    keys = iter(jax.random.split(key, 64))
    p = {}
    p["prefix_w"] = nrm(next(keys), (LAYER_EMB_DIM, PROMPT_LENGTH * D_MODEL))
    p["prefix_b"] = jnp.zeros((PROMPT_LENGTH * D_MODEL,), jnp.float32)
    p["embed_tokens"] = nrm(next(keys), (VOCAB_SIZE, D_MODEL))
    p["embed_pos"] = nrm(next(keys), (MAX_LENGTH, D_MODEL))
    p["ln_emb_g"] = jnp.ones((D_MODEL,), jnp.float32)
    p["ln_emb_b"] = jnp.zeros((D_MODEL,), jnp.float32)
    p["final_logits_bias"] = jnp.zeros((VOCAB_SIZE,), jnp.float32)

    layers = []
    for _ in range(NUM_LAYERS):
        L = {}
        for name in ("self", "cross"):
            for proj in ("q", "k", "v", "o"):
                L[f"{name}_w{proj}"] = nrm(next(keys), (D_MODEL, D_MODEL))
                L[f"{name}_b{proj}"] = nrm(next(keys), (D_MODEL,), 0.02)
        L["fc1_w"] = nrm(next(keys), (D_MODEL, FFN_DIM))
        L["fc1_b"] = jnp.zeros((FFN_DIM,), jnp.float32)
        L["fc2_w"] = nrm(next(keys), (FFN_DIM, D_MODEL))
        L["fc2_b"] = jnp.zeros((D_MODEL,), jnp.float32)
        for ln in ("ln_self", "ln_cross", "ln_final"):
            L[f"{ln}_g"] = jnp.ones((D_MODEL,), jnp.float32)
            L[f"{ln}_b"] = jnp.zeros((D_MODEL,), jnp.float32)
        layers.append(L)
    p["layers"] = layers
    return p


# --------------------------------- main -------------------------------------
if __name__ == "__main__":
    key = jax.random.PRNGKey(0)
    pkey, lkey, ikey = jax.random.split(key, 3)
    params = init_params(pkey)

    B, L_TOK = 2, 12
    layer_latent = jax.random.normal(lkey, (B, LAYER_EMB_DIM), dtype=jnp.float32)
    # extra dim of size 1 to exercise the `input_ids.dim() > 2 -> squeeze(1)` path
    input_ids = jax.random.randint(ikey, (B, 1, L_TOK), 0, VOCAB_SIZE)

    logits = forward_pallas(params, layer_latent, input_ids)
    logits = jax.block_until_ready(logits)

    ref = forward_ref(params, layer_latent, input_ids)
    assert logits.shape == (B, L_TOK, VOCAB_SIZE), logits.shape
    assert jnp.allclose(logits, ref, atol=2e-3, rtol=2e-3), "Pallas kernel mismatch vs JAX reference"
    print("KERNEL_OK")
</pallas_src>

<mosaic_0001>
module attributes {stable_mosaic.version = 11 : i64} {
  func.func @_led_decoder_kernel(%arg0: i32, %arg1: memref<1x1x32xf32, #tpu.memory_space<vmem>>, %arg2: memref<1x12x1xi32, #tpu.memory_space<vmem>>, %arg3: memref<4x32x32xf32, #tpu.memory_space<vmem>>, %arg4: memref<128x32xf32, #tpu.memory_space<vmem>>, %arg5: memref<16x32xf32, #tpu.memory_space<vmem>>, %arg6: memref<4x128xf32, #tpu.memory_space<vmem>>, %arg7: memref<2x2x32x128xf32, #tpu.memory_space<vmem>>, %arg8: memref<2x2x128x32xf32, #tpu.memory_space<vmem>>, %arg9: memref<2x12x128xf32, #tpu.memory_space<vmem>>, %arg10: memref<1x12x128xf32, #tpu.memory_space<vmem>>) attributes {dimension_semantics = [#tpu.dimension_semantics<parallel>], iteration_bounds = array<i64: 2>, scalar_prefetch = 0 : i64, scratch_operands = 0 : i64, tpu.core_type = #tpu.core_type<tc>, window_params = [{transform_indices = @transform_0, window_bounds = array<i64: 1, 1, 32>}, {transform_indices = @transform_1, window_bounds = array<i64: 1, 12, 1>}, {pipeline_mode = #tpu.pipeline_mode<synchronous>, transform_indices = @transform_2, window_bounds = array<i64: 4, 32, 32>}, {pipeline_mode = #tpu.pipeline_mode<synchronous>, transform_indices = @transform_3, window_bounds = array<i64: 128, 32>}, {pipeline_mode = #tpu.pipeline_mode<synchronous>, transform_indices = @transform_4, window_bounds = array<i64: 16, 32>}, {pipeline_mode = #tpu.pipeline_mode<synchronous>, transform_indices = @transform_5, window_bounds = array<i64: 4, 128>}, {pipeline_mode = #tpu.pipeline_mode<synchronous>, transform_indices = @transform_6, window_bounds = array<i64: 2, 2, 32, 128>}, {pipeline_mode = #tpu.pipeline_mode<synchronous>, transform_indices = @transform_7, window_bounds = array<i64: 2, 2, 128, 32>}, {pipeline_mode = #tpu.pipeline_mode<synchronous>, transform_indices = @transform_8, window_bounds = array<i64: 2, 12, 128>}, {transform_indices = @transform_9, window_bounds = array<i64: 1, 12, 128>}]} {
    %c0 = arith.constant 0 : index
    %c0_0 = arith.constant 0 : index
    %0 = vector.load %arg6[%c0, %c0_0] : memref<4x128xf32, #tpu.memory_space<vmem>>, vector<4x128xf32>
    %1 = vector.extract_strided_slice %0 {offsets = [0, 0], sizes = [1, 32], strides = [1, 1]} : vector<4x128xf32> to vector<1x32xf32>
    %2 = vector.extract_strided_slice %0 {offsets = [1, 0], sizes = [1, 32], strides = [1, 1]} : vector<4x128xf32> to vector<1x32xf32>
    %3 = vector.extract_strided_slice %0 {offsets = [2, 0], sizes = [1, 128], strides = [1, 1]} : vector<4x128xf32> to vector<1x128xf32>
    %c0_1 = arith.constant 0 : index
    %c0_2 = arith.constant 0 : index
    %c0_3 = arith.constant 0 : index
    %4 = vector.load %arg1[%c0_1, %c0_2, %c0_3] : memref<1x1x32xf32, #tpu.memory_space<vmem>>, vector<1x1x32xf32>
    %5 = vector.shape_cast %4 : vector<1x1x32xf32> to vector<1x32xf32>
    %c0_4 = arith.constant 0 : index
    %c0_5 = arith.constant 0 : index
    %c0_6 = arith.constant 0 : index
    %6 = vector.load %arg3[%c0_4, %c0_5, %c0_6] : memref<4x32x32xf32, #tpu.memory_space<vmem>>, vector<1x32x32xf32>
    %7 = vector.shape_cast %6 : vector<1x32x32xf32> to vector<32x32xf32>
    %cst = arith.constant dense<0.000000e+00> : vector<1x32xf32>
    %8 = tpu.matmul %5, %7, %cst {dimension_numbers = #tpu.dot_dimension_numbers<[1], [0], [0], [1], [0, 0, 1, 1], [], []>} : vector<1x32xf32>, vector<32x32xf32>, vector<1x32xf32> -> vector<1x32xf32>
    %c1 = arith.constant 1 : index
    %c0_7 = arith.constant 0 : index
    %c0_8 = arith.constant 0 : index
    %9 = vector.load %arg3[%c1, %c0_7, %c0_8] : memref<4x32x32xf32, #tpu.memory_space<vmem>>, vector<1x32x32xf32>
    %10 = vector.shape_cast %9 : vector<1x32x32xf32> to vector<32x32xf32>
    %cst_9 = arith.constant dense<0.000000e+00> : vector<1x32xf32>
    %11 = tpu.matmul %5, %10, %cst_9 {dimension_numbers = #tpu.dot_dimension_numbers<[1], [0], [0], [1], [0, 0, 1, 1], [], []>} : vector<1x32xf32>, vector<32x32xf32>, vector<1x32xf32> -> vector<1x32xf32>
    %c2 = arith.constant 2 : index
    %c0_10 = arith.constant 0 : index
    %c0_11 = arith.constant 0 : index
    %12 = vector.load %arg3[%c2, %c0_10, %c0_11] : memref<4x32x32xf32, #tpu.memory_space<vmem>>, vector<1x32x32xf32>
    %13 = vector.shape_cast %12 : vector<1x32x32xf32> to vector<32x32xf32>
    %cst_12 = arith.constant dense<0.000000e+00> : vector<1x32xf32>
    %14 = tpu.matmul %5, %13, %cst_12 {dimension_numbers = #tpu.dot_dimension_numbers<[1], [0], [0], [1], [0, 0, 1, 1], [], []>} : vector<1x32xf32>, vector<32x32xf32>, vector<1x32xf32> -> vector<1x32xf32>
    %c3 = arith.constant 3 : index
    %c0_13 = arith.constant 0 : index
    %c0_14 = arith.constant 0 : index
    %15 = vector.load %arg3[%c3, %c0_13, %c0_14] : memref<4x32x32xf32, #tpu.memory_space<vmem>>, vector<1x32x32xf32>
    %16 = vector.shape_cast %15 : vector<1x32x32xf32> to vector<32x32xf32>
    %cst_15 = arith.constant dense<0.000000e+00> : vector<1x32xf32>
    %17 = tpu.matmul %5, %16, %cst_15 {dimension_numbers = #tpu.dot_dimension_numbers<[1], [0], [0], [1], [0, 0, 1, 1], [], []>} : vector<1x32xf32>, vector<32x32xf32>, vector<1x32xf32> -> vector<1x32xf32>
    %c0_16 = arith.constant 0 : index
    %c0_17 = arith.constant 0 : index
    %c0_18 = arith.constant 0 : index
    %18 = vector.load %arg2[%c0_16, %c0_17, %c0_18] : memref<1x12x1xi32, #tpu.memory_space<vmem>>, vector<1x12x1xi32>
    %19 = vector.shape_cast %18 : vector<1x12x1xi32> to vector<12x1xi32>
    %20 = tpu.iota {dimensions = array<i32: 1>} : vector<12x128xi32>
    %21 = vector.broadcast %19 : vector<12x1xi32> to vector<12x128xi32>
    %22 = arith.cmpi eq, %21, %20 : vector<12x128xi32>
    %23 = arith.extui %22 : vector<12x128xi1> to vector<12x128xi32>
    %24 = arith.sitofp %23 : vector<12x128xi32> to vector<12x128xf32>
    %c0_19 = arith.constant 0 : index
    %c0_20 = arith.constant 0 : index
    %25 = vector.load %arg4[%c0_19, %c0_20] : memref<128x32xf32, #tpu.memory_space<vmem>>, vector<128x32xf32>
    %cst_21 = arith.constant dense<0.000000e+00> : vector<12x32xf32>
    %26 = tpu.matmul %24, %25, %cst_21 {dimension_numbers = #tpu.dot_dimension_numbers<[1], [0], [0], [1], [0, 0, 1, 1], [], []>} : vector<12x128xf32>, vector<128x32xf32>, vector<12x32xf32> -> vector<12x32xf32>
    %27 = tpu.concatenate %8, %11, %14, %17, %26 in 0 : vector<1x32xf32>, vector<1x32xf32>, vector<1x32xf32>, vector<1x32xf32>, vector<12x32xf32> -> vector<16x32xf32>
    %c0_22 = arith.constant 0 : index
    %c0_23 = arith.constant 0 : index
    %28 = vector.load %arg5[%c0_22, %c0_23] : memref<16x32xf32, #tpu.memory_space<vmem>>, vector<16x32xf32>
    %29 = arith.addf %27, %28 : vector<16x32xf32>
    %cst_24 = arith.constant dense<0.000000e+00> : vector<16xf32>
    %30 = vector.multi_reduction <add>, %29, %cst_24 [1] : vector<16x32xf32> to vector<16xf32>
    %31 = vector.shape_cast %30 : vector<16xf32> to vector<16x1xf32>
    %cst_25 = arith.constant 3.200000e+01 : f32
    %32 = vector.broadcast %cst_25 : f32 to vector<16x1xf32>
    %33 = arith.divf %31, %32 : vector<16x1xf32>
    %34 = vector.broadcast %33 : vector<16x1xf32> to vector<16x32xf32>
    %35 = arith.subf %29, %34 : vector<16x32xf32>
    %36 = arith.mulf %35, %35 : vector<16x32xf32>
    %cst_26 = arith.constant dense<0.000000e+00> : vector<16xf32>
    %37 = vector.multi_reduction <add>, %36, %cst_26 [1] : vector<16x32xf32> to vector<16xf32>
    %38 = vector.shape_cast %37 : vector<16xf32> to vector<16x1xf32>
    %cst_27 = arith.constant 3.200000e+01 : f32
    %39 = vector.broadcast %cst_27 : f32 to vector<16x1xf32>
    %40 = arith.divf %38, %39 : vector<16x1xf32>
    %41 = vector.broadcast %33 : vector<16x1xf32> to vector<16x32xf32>
    %42 = arith.subf %29, %41 : vector<16x32xf32>
    %cst_28 = arith.constant 9.99999974E-6 : f32
    %43 = vector.broadcast %cst_28 : f32 to vector<16x1xf32>
    %44 = arith.addf %40, %43 : vector<16x1xf32>
    %45 = math.rsqrt %44 : vector<16x1xf32>
    %46 = vector.broadcast %45 : vector<16x1xf32> to vector<16x32xf32>
    %47 = arith.mulf %42, %46 : vector<16x32xf32>
    %48 = vector.broadcast %1 : vector<1x32xf32> to vector<16x32xf32>
    %49 = arith.mulf %47, %48 : vector<16x32xf32>
    %50 = vector.broadcast %2 : vector<1x32xf32> to vector<16x32xf32>
    %51 = arith.addf %49, %50 : vector<16x32xf32>
    %52 = tpu.iota {dimensions = array<i32: 0>} : vector<16x16xi32>
    %53 = tpu.iota {dimensions = array<i32: 1>} : vector<16x16xi32>
    %54 = arith.cmpi sle, %53, %52 : vector<16x16xi32>
    %c0_29 = arith.constant 0 : index
    %c0_30 = arith.constant 0 : index
    %c0_31 = arith.constant 0 : index
    %c0_32 = arith.constant 0 : index
    %55 = vector.load %arg7[%c0_29, %c0_30, %c0_31, %c0_32] : memref<2x2x32x128xf32, #tpu.memory_space<vmem>>, vector<1x1x32x128xf32>
    %56 = vector.shape_cast %55 : vector<1x1x32x128xf32> to vector<32x128xf32>
    %c0_33 = arith.constant 0 : index
    %c1_34 = arith.constant 1 : index
    %c0_35 = arith.constant 0 : index
    %c0_36 = arith.constant 0 : index
    %57 = vector.load %arg7[%c0_33, %c1_34, %c0_35, %c0_36] : memref<2x2x32x128xf32, #tpu.memory_space<vmem>>, vector<1x1x32x128xf32>
    %58 = vector.shape_cast %57 : vector<1x1x32x128xf32> to vector<32x128xf32>
    %c0_37 = arith.constant 0 : index
    %c0_38 = arith.constant 0 : index
    %c0_39 = arith.constant 0 : index
    %c0_40 = arith.constant 0 : index
    %59 = vector.load %arg8[%c0_37, %c0_38, %c0_39, %c0_40] : memref<2x2x128x32xf32, #tpu.memory_space<vmem>>, vector<1x1x128x32xf32>
    %60 = vector.shape_cast %59 : vector<1x1x128x32xf32> to vector<128x32xf32>
    %c0_41 = arith.constant 0 : index
    %c1_42 = arith.constant 1 : index
    %c0_43 = arith.constant 0 : index
    %c0_44 = arith.constant 0 : index
    %61 = vector.load %arg8[%c0_41, %c1_42, %c0_43, %c0_44] : memref<2x2x128x32xf32, #tpu.memory_space<vmem>>, vector<1x1x128x32xf32>
    %62 = vector.shape_cast %61 : vector<1x1x128x32xf32> to vector<128x32xf32>
    %c0_45 = arith.constant 0 : index
    %c0_46 = arith.constant 0 : index
    %c0_47 = arith.constant 0 : index
    %63 = vector.load %arg9[%c0_45, %c0_46, %c0_47] : memref<2x12x128xf32, #tpu.memory_space<vmem>>, vector<1x12x128xf32>
    %64 = vector.shape_cast %63 : vector<1x12x128xf32> to vector<12x128xf32>
    %65 = vector.extract_strided_slice %64 {offsets = [0, 0], sizes = [1, 128], strides = [1, 1]} : vector<12x128xf32> to vector<1x128xf32>
    %66 = vector.extract_strided_slice %64 {offsets = [1, 0], sizes = [1, 32], strides = [1, 1]} : vector<12x128xf32> to vector<1x32xf32>
    %67 = vector.extract_strided_slice %64 {offsets = [2, 0], sizes = [1, 32], strides = [1, 1]} : vector<12x128xf32> to vector<1x32xf32>
    %68 = vector.extract_strided_slice %64 {offsets = [3, 0], sizes = [1, 128], strides = [1, 1]} : vector<12x128xf32> to vector<1x128xf32>
    %69 = vector.extract_strided_slice %64 {offsets = [4, 0], sizes = [1, 32], strides = [1, 1]} : vector<12x128xf32> to vector<1x32xf32>
    %70 = vector.extract_strided_slice %64 {offsets = [5, 0], sizes = [1, 32], strides = [1, 1]} : vector<12x128xf32> to vector<1x32xf32>
    %71 = vector.extract_strided_slice %64 {offsets = [6, 0], sizes = [1, 32], strides = [1, 1]} : vector<12x128xf32> to vector<1x32xf32>
    %72 = vector.extract_strided_slice %64 {offsets = [7, 0], sizes = [1, 32], strides = [1, 1]} : vector<12x128xf32> to vector<1x32xf32>
    %73 = vector.extract_strided_slice %64 {offsets = [8, 0], sizes = [1, 32], strides = [1, 1]} : vector<12x128xf32> to vector<1x32xf32>
    %74 = vector.extract_strided_slice %64 {offsets = [9, 0], sizes = [1, 32], strides = [1, 1]} : vector<12x128xf32> to vector<1x32xf32>
    %75 = vector.extract_strided_slice %64 {offsets = [10, 0], sizes = [1, 32], strides = [1, 1]} : vector<12x128xf32> to vector<1x32xf32>
    %cst_48 = arith.constant dense<0.000000e+00> : vector<16x128xf32>
    %76 = tpu.matmul %51, %56, %cst_48 {dimension_numbers = #tpu.dot_dimension_numbers<[1], [0], [0], [1], [0, 0, 1, 1], [], []>} : vector<16x32xf32>, vector<32x128xf32>, vector<16x128xf32> -> vector<16x128xf32>
    %77 = vector.broadcast %65 : vector<1x128xf32> to vector<16x128xf32>
    %78 = arith.addf %76, %77 : vector<16x128xf32>
    %79 = vector.extract_strided_slice %78 {offsets = [0, 0], sizes = [16, 8], strides = [1, 1]} : vector<16x128xf32> to vector<16x8xf32>
    %80 = vector.extract_strided_slice %78 {offsets = [0, 32], sizes = [16, 8], strides = [1, 1]} : vector<16x128xf32> to vector<16x8xf32>
    %81 = vector.extract_strided_slice %78 {offsets = [0, 64], sizes = [16, 8], strides = [1, 1]} : vector<16x128xf32> to vector<16x8xf32>
    %cst_49 = arith.constant dense<0.000000e+00> : vector<16x16xf32>
    %82 = tpu.matmul %79, %80, %cst_49 {dimension_numbers = #tpu.dot_dimension_numbers<[1], [1], [0], [0], [0, 0, 1, 0], [], []>} : vector<16x8xf32>, vector<16x8xf32>, vector<16x16xf32> -> vector<16x16xf32>
    %cst_50 = arith.constant -1.000000e+09 : f32
    %83 = vector.broadcast %cst_50 : f32 to vector<16x16xf32>
    %84 = arith.select %54, %82, %83 : vector<16x16xi1>, vector<16x16xf32>
    %cst_51 = arith.constant dense<0xFF800000> : vector<16xf32>
    %85 = vector.multi_reduction <maximumf>, %84, %cst_51 [1] : vector<16x16xf32> to vector<16xf32>
    %86 = vector.shape_cast %85 : vector<16xf32> to vector<16x1xf32>
    %87 = vector.broadcast %86 : vector<16x1xf32> to vector<16x16xf32>
    %88 = arith.subf %84, %87 : vector<16x16xf32>
    %89 = math.exp %88 : vector<16x16xf32>
    %cst_52 = arith.constant dense<0.000000e+00> : vector<16xf32>
    %90 = vector.multi_reduction <add>, %89, %cst_52 [1] : vector<16x16xf32> to vector<16xf32>
    %91 = vector.shape_cast %90 : vector<16xf32> to vector<16x1xf32>
    %92 = tpu.reciprocal %91 {approx = true} : vector<16x1xf32> -> vector<16x1xf32>
    %93 = vector.broadcast %92 : vector<16x1xf32> to vector<16x16xf32>
    %94 = arith.mulf %89, %93 : vector<16x16xf32>
    %cst_53 = arith.constant dense<0.000000e+00> : vector<16x8xf32>
    %95 = tpu.matmul %94, %81, %cst_53 {dimension_numbers = #tpu.dot_dimension_numbers<[1], [0], [0], [1], [0, 0, 1, 1], [], []>} : vector<16x16xf32>, vector<16x8xf32>, vector<16x8xf32> -> vector<16x8xf32>
    %96 = vector.extract_strided_slice %60 {offsets = [0, 0], sizes = [8, 32], strides = [1, 1]} : vector<128x32xf32> to vector<8x32xf32>
    %cst_54 = arith.constant dense<0.000000e+00> : vector<16x32xf32>
    %97 = tpu.matmul %95, %96, %cst_54 {dimension_numbers = #tpu.dot_dimension_numbers<[1], [0], [0], [1], [0, 0, 1, 1], [], []>} : vector<16x8xf32>, vector<8x32xf32>, vector<16x32xf32> -> vector<16x32xf32>
    %98 = vector.broadcast %66 : vector<1x32xf32> to vector<16x32xf32>
    %99 = arith.addf %98, %97 : vector<16x32xf32>
    %100 = vector.extract_strided_slice %78 {offsets = [0, 8], sizes = [16, 8], strides = [1, 1]} : vector<16x128xf32> to vector<16x8xf32>
    %101 = vector.extract_strided_slice %78 {offsets = [0, 40], sizes = [16, 8], strides = [1, 1]} : vector<16x128xf32> to vector<16x8xf32>
    %102 = vector.extract_strided_slice %78 {offsets = [0, 72], sizes = [16, 8], strides = [1, 1]} : vector<16x128xf32> to vector<16x8xf32>
    %cst_55 = arith.constant dense<0.000000e+00> : vector<16x16xf32>
    %103 = tpu.matmul %100, %101, %cst_55 {dimension_numbers = #tpu.dot_dimension_numbers<[1], [1], [0], [0], [0, 0, 1, 0], [], []>} : vector<16x8xf32>, vector<16x8xf32>, vector<16x16xf32> -> vector<16x16xf32>
    %cst_56 = arith.constant -1.000000e+09 : f32
    %104 = vector.broadcast %cst_56 : f32 to vector<16x16xf32>
    %105 = arith.select %54, %103, %104 : vector<16x16xi1>, vector<16x16xf32>
    %cst_57 = arith.constant dense<0xFF800000> : vector<16xf32>
    %106 = vector.multi_reduction <maximumf>, %105, %cst_57 [1] : vector<16x16xf32> to vector<16xf32>
    %107 = vector.shape_cast %106 : vector<16xf32> to vector<16x1xf32>
    %108 = vector.broadcast %107 : vector<16x1xf32> to vector<16x16xf32>
    %109 = arith.subf %105, %108 : vector<16x16xf32>
    %110 = math.exp %109 : vector<16x16xf32>
    %cst_58 = arith.constant dense<0.000000e+00> : vector<16xf32>
    %111 = vector.multi_reduction <add>, %110, %cst_58 [1] : vector<16x16xf32> to vector<16xf32>
    %112 = vector.shape_cast %111 : vector<16xf32> to vector<16x1xf32>
    %113 = tpu.reciprocal %112 {approx = true} : vector<16x1xf32> -> vector<16x1xf32>
    %114 = vector.broadcast %113 : vector<16x1xf32> to vector<16x16xf32>
    %115 = arith.mulf %110, %114 : vector<16x16xf32>
    %cst_59 = arith.constant dense<0.000000e+00> : vector<16x8xf32>
    %116 = tpu.matmul %115, %102, %cst_59 {dimension_numbers = #tpu.dot_dimension_numbers<[1], [0], [0], [1], [0, 0, 1, 1], [], []>} : vector<16x16xf32>, vector<16x8xf32>, vector<16x8xf32> -> vector<16x8xf32>
    %117 = vector.extract_strided_slice %60 {offsets = [8, 0], sizes = [8, 32], strides = [1, 1]} : vector<128x32xf32> to vector<8x32xf32>
    %cst_60 = arith.constant dense<0.000000e+00> : vector<16x32xf32>
    %118 = tpu.matmul %116, %117, %cst_60 {dimension_numbers = #tpu.dot_dimension_numbers<[1], [0], [0], [1], [0, 0, 1, 1], [], []>} : vector<16x8xf32>, vector<8x32xf32>, vector<16x32xf32> -> vector<16x32xf32>
    %119 = arith.addf %99, %118 : vector<16x32xf32>
    %120 = vector.extract_strided_slice %78 {offsets = [0, 16], sizes = [16, 8], strides = [1, 1]} : vector<16x128xf32> to vector<16x8xf32>
    %121 = vector.extract_strided_slice %78 {offsets = [0, 48], sizes = [16, 8], strides = [1, 1]} : vector<16x128xf32> to vector<16x8xf32>
    %122 = vector.extract_strided_slice %78 {offsets = [0, 80], sizes = [16, 8], strides = [1, 1]} : vector<16x128xf32> to vector<16x8xf32>
    %cst_61 = arith.constant dense<0.000000e+00> : vector<16x16xf32>
    %123 = tpu.matmul %120, %121, %cst_61 {dimension_numbers = #tpu.dot_dimension_numbers<[1], [1], [0], [0], [0, 0, 1, 0], [], []>} : vector<16x8xf32>, vector<16x8xf32>, vector<16x16xf32> -> vector<16x16xf32>
    %cst_62 = arith.constant -1.000000e+09 : f32
    %124 = vector.broadcast %cst_62 : f32 to vector<16x16xf32>
    %125 = arith.select %54, %123, %124 : vector<16x16xi1>, vector<16x16xf32>
    %cst_63 = arith.constant dense<0xFF800000> : vector<16xf32>
    %126 = vector.multi_reduction <maximumf>, %125, %cst_63 [1] : vector<16x16xf32> to vector<16xf32>
    %127 = vector.shape_cast %126 : vector<16xf32> to vector<16x1xf32>
    %128 = vector.broadcast %127 : vector<16x1xf32> to vector<16x16xf32>
    %129 = arith.subf %125, %128 : vector<16x16xf32>
    %130 = math.exp %129 : vector<16x16xf32>
    %cst_64 = arith.constant dense<0.000000e+00> : vector<16xf32>
    %131 = vector.multi_reduction <add>, %130, %cst_64 [1] : vector<16x16xf32> to vector<16xf32>
    %132 = vector.shape_cast %131 : vector<16xf32> to vector<16x1xf32>
    %133 = tpu.reciprocal %132 {approx = true} : vector<16x1xf32> -> vector<16x1xf32>
    %134 = vector.broadcast %133 : vector<16x1xf32> to vector<16x16xf32>
    %135 = arith.mulf %130, %134 : vector<16x16xf32>
    %cst_65 = arith.constant dense<0.000000e+00> : vector<16x8xf32>
    %136 = tpu.matmul %135, %122, %cst_65 {dimension_numbers = #tpu.dot_dimension_numbers<[1], [0], [0], [1], [0, 0, 1, 1], [], []>} : vector<16x16xf32>, vector<16x8xf32>, vector<16x8xf32> -> vector<16x8xf32>
    %137 = vector.extract_strided_slice %60 {offsets = [16, 0], sizes = [8, 32], strides = [1, 1]} : vector<128x32xf32> to vector<8x32xf32>
    %cst_66 = arith.constant dense<0.000000e+00> : vector<16x32xf32>
    %138 = tpu.matmul %136, %137, %cst_66 {dimension_numbers = #tpu.dot_dimension_numbers<[1], [0], [0], [1], [0, 0, 1, 1], [], []>} : vector<16x8xf32>, vector<8x32xf32>, vector<16x32xf32> -> vector<16x32xf32>
    %139 = arith.addf %119, %138 : vector<16x32xf32>
    %140 = vector.extract_strided_slice %78 {offsets = [0, 24], sizes = [16, 8], strides = [1, 1]} : vector<16x128xf32> to vector<16x8xf32>
    %141 = vector.extract_strided_slice %78 {offsets = [0, 56], sizes = [16, 8], strides = [1, 1]} : vector<16x128xf32> to vector<16x8xf32>
    %142 = vector.extract_strided_slice %78 {offsets = [0, 88], sizes = [16, 8], strides = [1, 1]} : vector<16x128xf32> to vector<16x8xf32>
    %cst_67 = arith.constant dense<0.000000e+00> : vector<16x16xf32>
    %143 = tpu.matmul %140, %141, %cst_67 {dimension_numbers = #tpu.dot_dimension_numbers<[1], [1], [0], [0], [0, 0, 1, 0], [], []>} : vector<16x8xf32>, vector<16x8xf32>, vector<16x16xf32> -> vector<16x16xf32>
    %cst_68 = arith.constant -1.000000e+09 : f32
    %144 = vector.broadcast %cst_68 : f32 to vector<16x16xf32>
    %145 = arith.select %54, %143, %144 : vector<16x16xi1>, vector<16x16xf32>
    %cst_69 = arith.constant dense<0xFF800000> : vector<16xf32>
    %146 = vector.multi_reduction <maximumf>, %145, %cst_69 [1] : vector<16x16xf32> to vector<16xf32>
    %147 = vector.shape_cast %146 : vector<16xf32> to vector<16x1xf32>
    %148 = vector.broadcast %147 : vector<16x1xf32> to vector<16x16xf32>
    %149 = arith.subf %145, %148 : vector<16x16xf32>
    %150 = math.exp %149 : vector<16x16xf32>
    %cst_70 = arith.constant dense<0.000000e+00> : vector<16xf32>
    %151 = vector.multi_reduction <add>, %150, %cst_70 [1] : vector<16x16xf32> to vector<16xf32>
    %152 = vector.shape_cast %151 : vector<16xf32> to vector<16x1xf32>
    %153 = tpu.reciprocal %152 {approx = true} : vector<16x1xf32> -> vector<16x1xf32>
    %154 = vector.broadcast %153 : vector<16x1xf32> to vector<16x16xf32>
    %155 = arith.mulf %150, %154 : vector<16x16xf32>
    %cst_71 = arith.constant dense<0.000000e+00> : vector<16x8xf32>
    %156 = tpu.matmul %155, %142, %cst_71 {dimension_numbers = #tpu.dot_dimension_numbers<[1], [0], [0], [1], [0, 0, 1, 1], [], []>} : vector<16x16xf32>, vector<16x8xf32>, vector<16x8xf32> -> vector<16x8xf32>
    %157 = vector.extract_strided_slice %60 {offsets = [24, 0], sizes = [8, 32], strides = [1, 1]} : vector<128x32xf32> to vector<8x32xf32>
    %cst_72 = arith.constant dense<0.000000e+00> : vector<16x32xf32>
    %158 = tpu.matmul %156, %157, %cst_72 {dimension_numbers = #tpu.dot_dimension_numbers<[1], [0], [0], [1], [0, 0, 1, 1], [], []>} : vector<16x8xf32>, vector<8x32xf32>, vector<16x32xf32> -> vector<16x32xf32>
    %159 = arith.addf %139, %158 : vector<16x32xf32>
    %160 = arith.addf %51, %159 : vector<16x32xf32>
    %cst_73 = arith.constant dense<0.000000e+00> : vector<16xf32>
    %161 = vector.multi_reduction <add>, %160, %cst_73 [1] : vector<16x32xf32> to vector<16xf32>
    %162 = vector.shape_cast %161 : vector<16xf32> to vector<16x1xf32>
    %cst_74 = arith.constant 3.200000e+01 : f32
    %163 = vector.broadcast %cst_74 : f32 to vector<16x1xf32>
    %164 = arith.divf %162, %163 : vector<16x1xf32>
    %165 = vector.broadcast %164 : vector<16x1xf32> to vector<16x32xf32>
    %166 = arith.subf %160, %165 : vector<16x32xf32>
    %167 = arith.mulf %166, %166 : vector<16x32xf32>
    %cst_75 = arith.constant dense<0.000000e+00> : vector<16xf32>
    %168 = vector.multi_reduction <add>, %167, %cst_75 [1] : vector<16x32xf32> to vector<16xf32>
    %169 = vector.shape_cast %168 : vector<16xf32> to vector<16x1xf32>
    %cst_76 = arith.constant 3.200000e+01 : f32
    %170 = vector.broadcast %cst_76 : f32 to vector<16x1xf32>
    %171 = arith.divf %169, %170 : vector<16x1xf32>
    %172 = vector.broadcast %164 : vector<16x1xf32> to vector<16x32xf32>
    %173 = arith.subf %160, %172 : vector<16x32xf32>
    %cst_77 = arith.constant 9.99999974E-6 : f32
    %174 = vector.broadcast %cst_77 : f32 to vector<16x1xf32>
    %175 = arith.addf %171, %174 : vector<16x1xf32>
    %176 = math.rsqrt %175 : vector<16x1xf32>
    %177 = vector.broadcast %176 : vector<16x1xf32> to vector<16x32xf32>
    %178 = arith.mulf %173, %177 : vector<16x32xf32>
    %179 = vector.broadcast %70 : vector<1x32xf32> to vector<16x32xf32>
    %180 = arith.mulf %178, %179 : vector<16x32xf32>
    %181 = vector.broadcast %71 : vector<1x32xf32> to vector<16x32xf32>
    %182 = arith.addf %180, %181 : vector<16x32xf32>
    %183 = vector.broadcast %67 : vector<1x32xf32> to vector<16x32xf32>
    %184 = arith.addf %182, %183 : vector<16x32xf32>
    %cst_78 = arith.constant dense<0.000000e+00> : vector<16xf32>
    %185 = vector.multi_reduction <add>, %184, %cst_78 [1] : vector<16x32xf32> to vector<16xf32>
    %186 = vector.shape_cast %185 : vector<16xf32> to vector<16x1xf32>
    %cst_79 = arith.constant 3.200000e+01 : f32
    %187 = vector.broadcast %cst_79 : f32 to vector<16x1xf32>
    %188 = arith.divf %186, %187 : vector<16x1xf32>
    %189 = vector.broadcast %188 : vector<16x1xf32> to vector<16x32xf32>
    %190 = arith.subf %184, %189 : vector<16x32xf32>
    %191 = arith.mulf %190, %190 : vector<16x32xf32>
    %cst_80 = arith.constant dense<0.000000e+00> : vector<16xf32>
    %192 = vector.multi_reduction <add>, %191, %cst_80 [1] : vector<16x32xf32> to vector<16xf32>
    %193 = vector.shape_cast %192 : vector<16xf32> to vector<16x1xf32>
    %cst_81 = arith.constant 3.200000e+01 : f32
    %194 = vector.broadcast %cst_81 : f32 to vector<16x1xf32>
    %195 = arith.divf %193, %194 : vector<16x1xf32>
    %196 = vector.broadcast %188 : vector<16x1xf32> to vector<16x32xf32>
    %197 = arith.subf %184, %196 : vector<16x32xf32>
    %cst_82 = arith.constant 9.99999974E-6 : f32
    %198 = vector.broadcast %cst_82 : f32 to vector<16x1xf32>
    %199 = arith.addf %195, %198 : vector<16x1xf32>
    %200 = math.rsqrt %199 : vector<16x1xf32>
    %201 = vector.broadcast %200 : vector<16x1xf32> to vector<16x32xf32>
    %202 = arith.mulf %197, %201 : vector<16x32xf32>
    %203 = vector.broadcast %72 : vector<1x32xf32> to vector<16x32xf32>
    %204 = arith.mulf %202, %203 : vector<16x32xf32>
    %205 = vector.broadcast %73 : vector<1x32xf32> to vector<16x32xf32>
    %206 = arith.addf %204, %205 : vector<16x32xf32>
    %cst_83 = arith.constant dense<0.000000e+00> : vector<16x128xf32>
    %207 = tpu.matmul %206, %58, %cst_83 {dimension_numbers = #tpu.dot_dimension_numbers<[1], [0], [0], [1], [0, 0, 1, 1], [], []>} : vector<16x32xf32>, vector<32x128xf32>, vector<16x128xf32> -> vector<16x128xf32>
    %208 = vector.broadcast %68 : vector<1x128xf32> to vector<16x128xf32>
    %209 = arith.addf %207, %208 : vector<16x128xf32>
    %210 = arith.mulf %209, %209 : vector<16x128xf32>
    %211 = arith.mulf %209, %210 : vector<16x128xf32>
    %cst_84 = arith.constant 4.471500e-02 : f32
    %212 = vector.broadcast %cst_84 : f32 to vector<16x128xf32>
    %213 = arith.mulf %212, %211 : vector<16x128xf32>
    %214 = arith.addf %209, %213 : vector<16x128xf32>
    %cst_85 = arith.constant 0.797884583 : f32
    %215 = vector.broadcast %cst_85 : f32 to vector<16x128xf32>
    %216 = arith.mulf %215, %214 : vector<16x128xf32>
    %217 = math.tanh %216 : vector<16x128xf32>
    %cst_86 = arith.constant 1.000000e+00 : f32
    %218 = vector.broadcast %cst_86 : f32 to vector<16x128xf32>
    %219 = arith.addf %218, %217 : vector<16x128xf32>
    %cst_87 = arith.constant 5.000000e-01 : f32
    %220 = vector.broadcast %cst_87 : f32 to vector<16x128xf32>
    %221 = arith.mulf %220, %219 : vector<16x128xf32>
    %222 = arith.mulf %209, %221 : vector<16x128xf32>
    %cst_88 = arith.constant dense<0.000000e+00> : vector<16x32xf32>
    %223 = tpu.matmul %222, %62, %cst_88 {dimension_numbers = #tpu.dot_dimension_numbers<[1], [0], [0], [1], [0, 0, 1, 1], [], []>} : vector<16x128xf32>, vector<128x32xf32>, vector<16x32xf32> -> vector<16x32xf32>
    %224 = vector.broadcast %69 : vector<1x32xf32> to vector<16x32xf32>
    %225 = arith.addf %223, %224 : vector<16x32xf32>
    %226 = arith.addf %206, %225 : vector<16x32xf32>
    %cst_89 = arith.constant dense<0.000000e+00> : vector<16xf32>
    %227 = vector.multi_reduction <add>, %226, %cst_89 [1] : vector<16x32xf32> to vector<16xf32>
    %228 = vector.shape_cast %227 : vector<16xf32> to vector<16x1xf32>
    %cst_90 = arith.constant 3.200000e+01 : f32
    %229 = vector.broadcast %cst_90 : f32 to vector<16x1xf32>
    %230 = arith.divf %228, %229 : vector<16x1xf32>
    %231 = vector.broadcast %230 : vector<16x1xf32> to vector<16x32xf32>
    %232 = arith.subf %226, %231 : vector<16x32xf32>
    %233 = arith.mulf %232, %232 : vector<16x32xf32>
    %cst_91 = arith.constant dense<0.000000e+00> : vector<16xf32>
    %234 = vector.multi_reduction <add>, %233, %cst_91 [1] : vector<16x32xf32> to vector<16xf32>
    %235 = vector.shape_cast %234 : vector<16xf32> to vector<16x1xf32>
    %cst_92 = arith.constant 3.200000e+01 : f32
    %236 = vector.broadcast %cst_92 : f32 to vector<16x1xf32>
    %237 = arith.divf %235, %236 : vector<16x1xf32>
    %238 = vector.broadcast %230 : vector<16x1xf32> to vector<16x32xf32>
    %239 = arith.subf %226, %238 : vector<16x32xf32>
    %cst_93 = arith.constant 9.99999974E-6 : f32
    %240 = vector.broadcast %cst_93 : f32 to vector<16x1xf32>
    %241 = arith.addf %237, %240 : vector<16x1xf32>
    %242 = math.rsqrt %241 : vector<16x1xf32>
    %243 = vector.broadcast %242 : vector<16x1xf32> to vector<16x32xf32>
    %244 = arith.mulf %239, %243 : vector<16x32xf32>
    %245 = vector.broadcast %74 : vector<1x32xf32> to vector<16x32xf32>
    %246 = arith.mulf %244, %245 : vector<16x32xf32>
    %247 = vector.broadcast %75 : vector<1x32xf32> to vector<16x32xf32>
    %248 = arith.addf %246, %247 : vector<16x32xf32>
    %c1_94 = arith.constant 1 : index
    %c0_95 = arith.constant 0 : index
    %c0_96 = arith.constant 0 : index
    %c0_97 = arith.constant 0 : index
    %249 = vector.load %arg7[%c1_94, %c0_95, %c0_96, %c0_97] : memref<2x2x32x128xf32, #tpu.memory_space<vmem>>, vector<1x1x32x128xf32>
    %250 = vector.shape_cast %249 : vector<1x1x32x128xf32> to vector<32x128xf32>
    %c1_98 = arith.constant 1 : index
    %c1_99 = arith.constant 1 : index
    %c0_100 = arith.constant 0 : index
    %c0_101 = arith.constant 0 : index
    %251 = vector.load %arg7[%c1_98, %c1_99, %c0_100, %c0_101] : memref<2x2x32x128xf32, #tpu.memory_space<vmem>>, vector<1x1x32x128xf32>
    %252 = vector.shape_cast %251 : vector<1x1x32x128xf32> to vector<32x128xf32>
    %c1_102 = arith.constant 1 : index
    %c0_103 = arith.constant 0 : index
    %c0_104 = arith.constant 0 : index
    %c0_105 = arith.constant 0 : index
    %253 = vector.load %arg8[%c1_102, %c0_103, %c0_104, %c0_105] : memref<2x2x128x32xf32, #tpu.memory_space<vmem>>, vector<1x1x128x32xf32>
    %254 = vector.shape_cast %253 : vector<1x1x128x32xf32> to vector<128x32xf32>
    %c1_106 = arith.constant 1 : index
    %c1_107 = arith.constant 1 : index
    %c0_108 = arith.constant 0 : index
    %c0_109 = arith.constant 0 : index
    %255 = vector.load %arg8[%c1_106, %c1_107, %c0_108, %c0_109] : memref<2x2x128x32xf32, #tpu.memory_space<vmem>>, vector<1x1x128x32xf32>
    %256 = vector.shape_cast %255 : vector<1x1x128x32xf32> to vector<128x32xf32>
    %c1_110 = arith.constant 1 : index
    %c0_111 = arith.constant 0 : index
    %c0_112 = arith.constant 0 : index
    %257 = vector.load %arg9[%c1_110, %c0_111, %c0_112] : memref<2x12x128xf32, #tpu.memory_space<vmem>>, vector<1x12x128xf32>
    %258 = vector.shape_cast %257 : vector<1x12x128xf32> to vector<12x128xf32>
    %259 = vector.extract_strided_slice %258 {offsets = [0, 0], sizes = [1, 128], strides = [1, 1]} : vector<12x128xf32> to vector<1x128xf32>
    %260 = vector.extract_strided_slice %258 {offsets = [1, 0], sizes = [1, 32], strides = [1, 1]} : vector<12x128xf32> to vector<1x32xf32>
    %261 = vector.extract_strided_slice %258 {offsets = [2, 0], sizes = [1, 32], strides = [1, 1]} : vector<12x128xf32> to vector<1x32xf32>
    %262 = vector.extract_strided_slice %258 {offsets = [3, 0], sizes = [1, 128], strides = [1, 1]} : vector<12x128xf32> to vector<1x128xf32>
    %263 = vector.extract_strided_slice %258 {offsets = [4, 0], sizes = [1, 32], strides = [1, 1]} : vector<12x128xf32> to vector<1x32xf32>
    %264 = vector.extract_strided_slice %258 {offsets = [5, 0], sizes = [1, 32], strides = [1, 1]} : vector<12x128xf32> to vector<1x32xf32>
    %265 = vector.extract_strided_slice %258 {offsets = [6, 0], sizes = [1, 32], strides = [1, 1]} : vector<12x128xf32> to vector<1x32xf32>
    %266 = vector.extract_strided_slice %258 {offsets = [7, 0], sizes = [1, 32], strides = [1, 1]} : vector<12x128xf32> to vector<1x32xf32>
    %267 = vector.extract_strided_slice %258 {offsets = [8, 0], sizes = [1, 32], strides = [1, 1]} : vector<12x128xf32> to vector<1x32xf32>
    %268 = vector.extract_strided_slice %258 {offsets = [9, 0], sizes = [1, 32], strides = [1, 1]} : vector<12x128xf32> to vector<1x32xf32>
    %269 = vector.extract_strided_slice %258 {offsets = [10, 0], sizes = [1, 32], strides = [1, 1]} : vector<12x128xf32> to vector<1x32xf32>
    %cst_113 = arith.constant dense<0.000000e+00> : vector<16x128xf32>
    %270 = tpu.matmul %248, %250, %cst_113 {dimension_numbers = #tpu.dot_dimension_numbers<[1], [0], [0], [1], [0, 0, 1, 1], [], []>} : vector<16x32xf32>, vector<32x128xf32>, vector<16x128xf32> -> vector<16x128xf32>
    %271 = vector.broadcast %259 : vector<1x128xf32> to vector<16x128xf32>
    %272 = arith.addf %270, %271 : vector<16x128xf32>
    %273 = vector.extract_strided_slice %272 {offsets = [0, 0], sizes = [16, 8], strides = [1, 1]} : vector<16x128xf32> to vector<16x8xf32>
    %274 = vector.extract_strided_slice %272 {offsets = [0, 32], sizes = [16, 8], strides = [1, 1]} : vector<16x128xf32> to vector<16x8xf32>
    %275 = vector.extract_strided_slice %272 {offsets = [0, 64], sizes = [16, 8], strides = [1, 1]} : vector<16x128xf32> to vector<16x8xf32>
    %cst_114 = arith.constant dense<0.000000e+00> : vector<16x16xf32>
    %276 = tpu.matmul %273, %274, %cst_114 {dimension_numbers = #tpu.dot_dimension_numbers<[1], [1], [0], [0], [0, 0, 1, 0], [], []>} : vector<16x8xf32>, vector<16x8xf32>, vector<16x16xf32> -> vector<16x16xf32>
    %cst_115 = arith.constant -1.000000e+09 : f32
    %277 = vector.broadcast %cst_115 : f32 to vector<16x16xf32>
    %278 = arith.select %54, %276, %277 : vector<16x16xi1>, vector<16x16xf32>
    %cst_116 = arith.constant dense<0xFF800000> : vector<16xf32>
    %279 = vector.multi_reduction <maximumf>, %278, %cst_116 [1] : vector<16x16xf32> to vector<16xf32>
    %280 = vector.shape_cast %279 : vector<16xf32> to vector<16x1xf32>
    %281 = vector.broadcast %280 : vector<16x1xf32> to vector<16x16xf32>
    %282 = arith.subf %278, %281 : vector<16x16xf32>
    %283 = math.exp %282 : vector<16x16xf32>
    %cst_117 = arith.constant dense<0.000000e+00> : vector<16xf32>
    %284 = vector.multi_reduction <add>, %283, %cst_117 [1] : vector<16x16xf32> to vector<16xf32>
    %285 = vector.shape_cast %284 : vector<16xf32> to vector<16x1xf32>
    %286 = tpu.reciprocal %285 {approx = true} : vector<16x1xf32> -> vector<16x1xf32>
    %287 = vector.broadcast %286 : vector<16x1xf32> to vector<16x16xf32>
    %288 = arith.mulf %283, %287 : vector<16x16xf32>
    %cst_118 = arith.constant dense<0.000000e+00> : vector<16x8xf32>
    %289 = tpu.matmul %288, %275, %cst_118 {dimension_numbers = #tpu.dot_dimension_numbers<[1], [0], [0], [1], [0, 0, 1, 1], [], []>} : vector<16x16xf32>, vector<16x8xf32>, vector<16x8xf32> -> vector<16x8xf32>
    %290 = vector.extract_strided_slice %254 {offsets = [0, 0], sizes = [8, 32], strides = [1, 1]} : vector<128x32xf32> to vector<8x32xf32>
    %cst_119 = arith.constant dense<0.000000e+00> : vector<16x32xf32>
    %291 = tpu.matmul %289, %290, %cst_119 {dimension_numbers = #tpu.dot_dimension_numbers<[1], [0], [0], [1], [0, 0, 1, 1], [], []>} : vector<16x8xf32>, vector<8x32xf32>, vector<16x32xf32> -> vector<16x32xf32>
    %292 = vector.broadcast %260 : vector<1x32xf32> to vector<16x32xf32>
    %293 = arith.addf %292, %291 : vector<16x32xf32>
    %294 = vector.extract_strided_slice %272 {offsets = [0, 8], sizes = [16, 8], strides = [1, 1]} : vector<16x128xf32> to vector<16x8xf32>
    %295 = vector.extract_strided_slice %272 {offsets = [0, 40], sizes = [16, 8], strides = [1, 1]} : vector<16x128xf32> to vector<16x8xf32>
    %296 = vector.extract_strided_slice %272 {offsets = [0, 72], sizes = [16, 8], strides = [1, 1]} : vector<16x128xf32> to vector<16x8xf32>
    %cst_120 = arith.constant dense<0.000000e+00> : vector<16x16xf32>
    %297 = tpu.matmul %294, %295, %cst_120 {dimension_numbers = #tpu.dot_dimension_numbers<[1], [1], [0], [0], [0, 0, 1, 0], [], []>} : vector<16x8xf32>, vector<16x8xf32>, vector<16x16xf32> -> vector<16x16xf32>
    %cst_121 = arith.constant -1.000000e+09 : f32
    %298 = vector.broadcast %cst_121 : f32 to vector<16x16xf32>
    %299 = arith.select %54, %297, %298 : vector<16x16xi1>, vector<16x16xf32>
    %cst_122 = arith.constant dense<0xFF800000> : vector<16xf32>
    %300 = vector.multi_reduction <maximumf>, %299, %cst_122 [1] : vector<16x16xf32> to vector<16xf32>
    %301 = vector.shape_cast %300 : vector<16xf32> to vector<16x1xf32>
    %302 = vector.broadcast %301 : vector<16x1xf32> to vector<16x16xf32>
    %303 = arith.subf %299, %302 : vector<16x16xf32>
    %304 = math.exp %303 : vector<16x16xf32>
    %cst_123 = arith.constant dense<0.000000e+00> : vector<16xf32>
    %305 = vector.multi_reduction <add>, %304, %cst_123 [1] : vector<16x16xf32> to vector<16xf32>
    %306 = vector.shape_cast %305 : vector<16xf32> to vector<16x1xf32>
    %307 = tpu.reciprocal %306 {approx = true} : vector<16x1xf32> -> vector<16x1xf32>
    %308 = vector.broadcast %307 : vector<16x1xf32> to vector<16x16xf32>
    %309 = arith.mulf %304, %308 : vector<16x16xf32>
    %cst_124 = arith.constant dense<0.000000e+00> : vector<16x8xf32>
    %310 = tpu.matmul %309, %296, %cst_124 {dimension_numbers = #tpu.dot_dimension_numbers<[1], [0], [0], [1], [0, 0, 1, 1], [], []>} : vector<16x16xf32>, vector<16x8xf32>, vector<16x8xf32> -> vector<16x8xf32>
    %311 = vector.extract_strided_slice %254 {offsets = [8, 0], sizes = [8, 32], strides = [1, 1]} : vector<128x32xf32> to vector<8x32xf32>
    %cst_125 = arith.constant dense<0.000000e+00> : vector<16x32xf32>
    %312 = tpu.matmul %310, %311, %cst_125 {dimension_numbers = #tpu.dot_dimension_numbers<[1], [0], [0], [1], [0, 0, 1, 1], [], []>} : vector<16x8xf32>, vector<8x32xf32>, vector<16x32xf32> -> vector<16x32xf32>
    %313 = arith.addf %293, %312 : vector<16x32xf32>
    %314 = vector.extract_strided_slice %272 {offsets = [0, 16], sizes = [16, 8], strides = [1, 1]} : vector<16x128xf32> to vector<16x8xf32>
    %315 = vector.extract_strided_slice %272 {offsets = [0, 48], sizes = [16, 8], strides = [1, 1]} : vector<16x128xf32> to vector<16x8xf32>
    %316 = vector.extract_strided_slice %272 {offsets = [0, 80], sizes = [16, 8], strides = [1, 1]} : vector<16x128xf32> to vector<16x8xf32>
    %cst_126 = arith.constant dense<0.000000e+00> : vector<16x16xf32>
    %317 = tpu.matmul %314, %315, %cst_126 {dimension_numbers = #tpu.dot_dimension_numbers<[1], [1], [0], [0], [0, 0, 1, 0], [], []>} : vector<16x8xf32>, vector<16x8xf32>, vector<16x16xf32> -> vector<16x16xf32>
    %cst_127 = arith.constant -1.000000e+09 : f32
    %318 = vector.broadcast %cst_127 : f32 to vector<16x16xf32>
    %319 = arith.select %54, %317, %318 : vector<16x16xi1>, vector<16x16xf32>
    %cst_128 = arith.constant dense<0xFF800000> : vector<16xf32>
    %320 = vector.multi_reduction <maximumf>, %319, %cst_128 [1] : vector<16x16xf32> to vector<16xf32>
    %321 = vector.shape_cast %320 : vector<16xf32> to vector<16x1xf32>
    %322 = vector.broadcast %321 : vector<16x1xf32> to vector<16x16xf32>
    %323 = arith.subf %319, %322 : vector<16x16xf32>
    %324 = math.exp %323 : vector<16x16xf32>
    %cst_129 = arith.constant dense<0.000000e+00> : vector<16xf32>
    %325 = vector.multi_reduction <add>, %324, %cst_129 [1] : vector<16x16xf32> to vector<16xf32>
    %326 = vector.shape_cast %325 : vector<16xf32> to vector<16x1xf32>
    %327 = tpu.reciprocal %326 {approx = true} : vector<16x1xf32> -> vector<16x1xf32>
    %328 = vector.broadcast %327 : vector<16x1xf32> to vector<16x16xf32>
    %329 = arith.mulf %324, %328 : vector<16x16xf32>
    %cst_130 = arith.constant dense<0.000000e+00> : vector<16x8xf32>
    %330 = tpu.matmul %329, %316, %cst_130 {dimension_numbers = #tpu.dot_dimension_numbers<[1], [0], [0], [1], [0, 0, 1, 1], [], []>} : vector<16x16xf32>, vector<16x8xf32>, vector<16x8xf32> -> vector<16x8xf32>
    %331 = vector.extract_strided_slice %254 {offsets = [16, 0], sizes = [8, 32], strides = [1, 1]} : vector<128x32xf32> to vector<8x32xf32>
    %cst_131 = arith.constant dense<0.000000e+00> : vector<16x32xf32>
    %332 = tpu.matmul %330, %331, %cst_131 {dimension_numbers = #tpu.dot_dimension_numbers<[1], [0], [0], [1], [0, 0, 1, 1], [], []>} : vector<16x8xf32>, vector<8x32xf32>, vector<16x32xf32> -> vector<16x32xf32>
    %333 = arith.addf %313, %332 : vector<16x32xf32>
    %334 = vector.extract_strided_slice %272 {offsets = [0, 24], sizes = [16, 8], strides = [1, 1]} : vector<16x128xf32> to vector<16x8xf32>
    %335 = vector.extract_strided_slice %272 {offsets = [0, 56], sizes = [16, 8], strides = [1, 1]} : vector<16x128xf32> to vector<16x8xf32>
    %336 = vector.extract_strided_slice %272 {offsets = [0, 88], sizes = [16, 8], strides = [1, 1]} : vector<16x128xf32> to vector<16x8xf32>
    %cst_132 = arith.constant dense<0.000000e+00> : vector<16x16xf32>
    %337 = tpu.matmul %334, %335, %cst_132 {dimension_numbers = #tpu.dot_dimension_numbers<[1], [1], [0], [0], [0, 0, 1, 0], [], []>} : vector<16x8xf32>, vector<16x8xf32>, vector<16x16xf32> -> vector<16x16xf32>
    %cst_133 = arith.constant -1.000000e+09 : f32
    %338 = vector.broadcast %cst_133 : f32 to vector<16x16xf32>
    %339 = arith.select %54, %337, %338 : vector<16x16xi1>, vector<16x16xf32>
    %cst_134 = arith.constant dense<0xFF800000> : vector<16xf32>
    %340 = vector.multi_reduction <maximumf>, %339, %cst_134 [1] : vector<16x16xf32> to vector<16xf32>
    %341 = vector.shape_cast %340 : vector<16xf32> to vector<16x1xf32>
    %342 = vector.broadcast %341 : vector<16x1xf32> to vector<16x16xf32>
    %343 = arith.subf %339, %342 : vector<16x16xf32>
    %344 = math.exp %343 : vector<16x16xf32>
    %cst_135 = arith.constant dense<0.000000e+00> : vector<16xf32>
    %345 = vector.multi_reduction <add>, %344, %cst_135 [1] : vector<16x16xf32> to vector<16xf32>
    %346 = vector.shape_cast %345 : vector<16xf32> to vector<16x1xf32>
    %347 = tpu.reciprocal %346 {approx = true} : vector<16x1xf32> -> vector<16x1xf32>
    %348 = vector.broadcast %347 : vector<16x1xf32> to vector<16x16xf32>
    %349 = arith.mulf %344, %348 : vector<16x16xf32>
    %cst_136 = arith.constant dense<0.000000e+00> : vector<16x8xf32>
    %350 = tpu.matmul %349, %336, %cst_136 {dimension_numbers = #tpu.dot_dimension_numbers<[1], [0], [0], [1], [0, 0, 1, 1], [], []>} : vector<16x16xf32>, vector<16x8xf32>, vector<16x8xf32> -> vector<16x8xf32>
    %351 = vector.extract_strided_slice %254 {offsets = [24, 0], sizes = [8, 32], strides = [1, 1]} : vector<128x32xf32> to vector<8x32xf32>
    %cst_137 = arith.constant dense<0.000000e+00> : vector<16x32xf32>
    %352 = tpu.matmul %350, %351, %cst_137 {dimension_numbers = #tpu.dot_dimension_numbers<[1], [0], [0], [1], [0, 0, 1, 1], [], []>} : vector<16x8xf32>, vector<8x32xf32>, vector<16x32xf32> -> vector<16x32xf32>
    %353 = arith.addf %333, %352 : vector<16x32xf32>
    %354 = arith.addf %248, %353 : vector<16x32xf32>
    %cst_138 = arith.constant dense<0.000000e+00> : vector<16xf32>
    %355 = vector.multi_reduction <add>, %354, %cst_138 [1] : vector<16x32xf32> to vector<16xf32>
    %356 = vector.shape_cast %355 : vector<16xf32> to vector<16x1xf32>
    %cst_139 = arith.constant 3.200000e+01 : f32
    %357 = vector.broadcast %cst_139 : f32 to vector<16x1xf32>
    %358 = arith.divf %356, %357 : vector<16x1xf32>
    %359 = vector.broadcast %358 : vector<16x1xf32> to vector<16x32xf32>
    %360 = arith.subf %354, %359 : vector<16x32xf32>
    %361 = arith.mulf %360, %360 : vector<16x32xf32>
    %cst_140 = arith.constant dense<0.000000e+00> : vector<16xf32>
    %362 = vector.multi_reduction <add>, %361, %cst_140 [1] : vector<16x32xf32> to vector<16xf32>
    %363 = vector.shape_cast %362 : vector<16xf32> to vector<16x1xf32>
    %cst_141 = arith.constant 3.200000e+01 : f32
    %364 = vector.broadcast %cst_141 : f32 to vector<16x1xf32>
    %365 = arith.divf %363, %364 : vector<16x1xf32>
    %366 = vector.broadcast %358 : vector<16x1xf32> to vector<16x32xf32>
    %367 = arith.subf %354, %366 : vector<16x32xf32>
    %cst_142 = arith.constant 9.99999974E-6 : f32
    %368 = vector.broadcast %cst_142 : f32 to vector<16x1xf32>
    %369 = arith.addf %365, %368 : vector<16x1xf32>
    %370 = math.rsqrt %369 : vector<16x1xf32>
    %371 = vector.broadcast %370 : vector<16x1xf32> to vector<16x32xf32>
    %372 = arith.mulf %367, %371 : vector<16x32xf32>
    %373 = vector.broadcast %264 : vector<1x32xf32> to vector<16x32xf32>
    %374 = arith.mulf %372, %373 : vector<16x32xf32>
    %375 = vector.broadcast %265 : vector<1x32xf32> to vector<16x32xf32>
    %376 = arith.addf %374, %375 : vector<16x32xf32>
    %377 = vector.broadcast %261 : vector<1x32xf32> to vector<16x32xf32>
    %378 = arith.addf %376, %377 : vector<16x32xf32>
    %cst_143 = arith.constant dense<0.000000e+00> : vector<16xf32>
    %379 = vector.multi_reduction <add>, %378, %cst_143 [1] : vector<16x32xf32> to vector<16xf32>
    %380 = vector.shape_cast %379 : vector<16xf32> to vector<16x1xf32>
    %cst_144 = arith.constant 3.200000e+01 : f32
    %381 = vector.broadcast %cst_144 : f32 to vector<16x1xf32>
    %382 = arith.divf %380, %381 : vector<16x1xf32>
    %383 = vector.broadcast %382 : vector<16x1xf32> to vector<16x32xf32>
    %384 = arith.subf %378, %383 : vector<16x32xf32>
    %385 = arith.mulf %384, %384 : vector<16x32xf32>
    %cst_145 = arith.constant dense<0.000000e+00> : vector<16xf32>
    %386 = vector.multi_reduction <add>, %385, %cst_145 [1] : vector<16x32xf32> to vector<16xf32>
    %387 = vector.shape_cast %386 : vector<16xf32> to vector<16x1xf32>
    %cst_146 = arith.constant 3.200000e+01 : f32
    %388 = vector.broadcast %cst_146 : f32 to vector<16x1xf32>
    %389 = arith.divf %387, %388 : vector<16x1xf32>
    %390 = vector.broadcast %382 : vector<16x1xf32> to vector<16x32xf32>
    %391 = arith.subf %378, %390 : vector<16x32xf32>
    %cst_147 = arith.constant 9.99999974E-6 : f32
    %392 = vector.broadcast %cst_147 : f32 to vector<16x1xf32>
    %393 = arith.addf %389, %392 : vector<16x1xf32>
    %394 = math.rsqrt %393 : vector<16x1xf32>
    %395 = vector.broadcast %394 : vector<16x1xf32> to vector<16x32xf32>
    %396 = arith.mulf %391, %395 : vector<16x32xf32>
    %397 = vector.broadcast %266 : vector<1x32xf32> to vector<16x32xf32>
    %398 = arith.mulf %396, %397 : vector<16x32xf32>
    %399 = vector.broadcast %267 : vector<1x32xf32> to vector<16x32xf32>
    %400 = arith.addf %398, %399 : vector<16x32xf32>
    %cst_148 = arith.constant dense<0.000000e+00> : vector<16x128xf32>
    %401 = tpu.matmul %400, %252, %cst_148 {dimension_numbers = #tpu.dot_dimension_numbers<[1], [0], [0], [1], [0, 0, 1, 1], [], []>} : vector<16x32xf32>, vector<32x128xf32>, vector<16x128xf32> -> vector<16x128xf32>
    %402 = vector.broadcast %262 : vector<1x128xf32> to vector<16x128xf32>
    %403 = arith.addf %401, %402 : vector<16x128xf32>
    %404 = arith.mulf %403, %403 : vector<16x128xf32>
    %405 = arith.mulf %403, %404 : vector<16x128xf32>
    %cst_149 = arith.constant 4.471500e-02 : f32
    %406 = vector.broadcast %cst_149 : f32 to vector<16x128xf32>
    %407 = arith.mulf %406, %405 : vector<16x128xf32>
    %408 = arith.addf %403, %407 : vector<16x128xf32>
    %cst_150 = arith.constant 0.797884583 : f32
    %409 = vector.broadcast %cst_150 : f32 to vector<16x128xf32>
    %410 = arith.mulf %409, %408 : vector<16x128xf32>
    %411 = math.tanh %410 : vector<16x128xf32>
    %cst_151 = arith.constant 1.000000e+00 : f32
    %412 = vector.broadcast %cst_151 : f32 to vector<16x128xf32>
    %413 = arith.addf %412, %411 : vector<16x128xf32>
    %cst_152 = arith.constant 5.000000e-01 : f32
    %414 = vector.broadcast %cst_152 : f32 to vector<16x128xf32>
    %415 = arith.mulf %414, %413 : vector<16x128xf32>
    %416 = arith.mulf %403, %415 : vector<16x128xf32>
    %cst_153 = arith.constant dense<0.000000e+00> : vector<16x32xf32>
    %417 = tpu.matmul %416, %256, %cst_153 {dimension_numbers = #tpu.dot_dimension_numbers<[1], [0], [0], [1], [0, 0, 1, 1], [], []>} : vector<16x128xf32>, vector<128x32xf32>, vector<16x32xf32> -> vector<16x32xf32>
    %418 = vector.broadcast %263 : vector<1x32xf32> to vector<16x32xf32>
    %419 = arith.addf %417, %418 : vector<16x32xf32>
    %420 = arith.addf %400, %419 : vector<16x32xf32>
    %cst_154 = arith.constant dense<0.000000e+00> : vector<16xf32>
    %421 = vector.multi_reduction <add>, %420, %cst_154 [1] : vector<16x32xf32> to vector<16xf32>
    %422 = vector.shape_cast %421 : vector<16xf32> to vector<16x1xf32>
    %cst_155 = arith.constant 3.200000e+01 : f32
    %423 = vector.broadcast %cst_155 : f32 to vector<16x1xf32>
    %424 = arith.divf %422, %423 : vector<16x1xf32>
    %425 = vector.broadcast %424 : vector<16x1xf32> to vector<16x32xf32>
    %426 = arith.subf %420, %425 : vector<16x32xf32>
    %427 = arith.mulf %426, %426 : vector<16x32xf32>
    %cst_156 = arith.constant dense<0.000000e+00> : vector<16xf32>
    %428 = vector.multi_reduction <add>, %427, %cst_156 [1] : vector<16x32xf32> to vector<16xf32>
    %429 = vector.shape_cast %428 : vector<16xf32> to vector<16x1xf32>
    %cst_157 = arith.constant 3.200000e+01 : f32
    %430 = vector.broadcast %cst_157 : f32 to vector<16x1xf32>
    %431 = arith.divf %429, %430 : vector<16x1xf32>
    %432 = vector.broadcast %424 : vector<16x1xf32> to vector<16x32xf32>
    %433 = arith.subf %420, %432 : vector<16x32xf32>
    %cst_158 = arith.constant 9.99999974E-6 : f32
    %434 = vector.broadcast %cst_158 : f32 to vector<16x1xf32>
    %435 = arith.addf %431, %434 : vector<16x1xf32>
    %436 = math.rsqrt %435 : vector<16x1xf32>
    %437 = vector.broadcast %436 : vector<16x1xf32> to vector<16x32xf32>
    %438 = arith.mulf %433, %437 : vector<16x32xf32>
    %439 = vector.broadcast %268 : vector<1x32xf32> to vector<16x32xf32>
    %440 = arith.mulf %438, %439 : vector<16x32xf32>
    %441 = vector.broadcast %269 : vector<1x32xf32> to vector<16x32xf32>
    %442 = arith.addf %440, %441 : vector<16x32xf32>
    %443 = vector.extract_strided_slice %442 {offsets = [4, 0], sizes = [12, 32], strides = [1, 1]} : vector<16x32xf32> to vector<12x32xf32>
    %cst_159 = arith.constant dense<0.000000e+00> : vector<12x128xf32>
    %444 = tpu.matmul %443, %25, %cst_159 {dimension_numbers = #tpu.dot_dimension_numbers<[1], [1], [0], [0], [0, 0, 1, 0], [], []>} : vector<12x32xf32>, vector<128x32xf32>, vector<12x128xf32> -> vector<12x128xf32>
    %445 = vector.broadcast %3 : vector<1x128xf32> to vector<12x128xf32>
    %446 = arith.addf %444, %445 : vector<12x128xf32>
    %c0_160 = arith.constant 0 : index
    %c0_161 = arith.constant 0 : index
    %c0_162 = arith.constant 0 : index
    %447 = vector.load %arg10[%c0_160, %c0_161, %c0_162] : memref<1x12x128xf32, #tpu.memory_space<vmem>>, vector<1x12x128xf32>
    %448 = vector.shape_cast %447 : vector<1x12x128xf32> to vector<12x128xf32>
    %449 = vector.shape_cast %446 : vector<12x128xf32> to vector<1x12x128xf32>
    tpu.vector_store %arg10[%c0_160, %c0_161, %c0_162], %449 {strides = array<i32>} : memref<1x12x128xf32, #tpu.memory_space<vmem>>, vector<1x12x128xf32>,
    return
  }
  func.func @transform_0(%arg0: i32) -> (i32, i32, i32) {
    %c0_i32 = arith.constant 0 : i32
    %c0_i32_0 = arith.constant 0 : i32
    %c0_i32_1 = arith.constant 0 : i32
    return %arg0, %c0_i32, %c0_i32_0 : i32, i32, i32
  }
  func.func @transform_1(%arg0: i32) -> (i32, i32, i32) {
    %c0_i32 = arith.constant 0 : i32
    %c0_i32_0 = arith.constant 0 : i32
    %c0_i32_1 = arith.constant 0 : i32
    return %arg0, %c0_i32, %c0_i32_0 : i32, i32, i32
  }
  func.func @transform_2(%arg0: i32) -> (i32, i32, i32) {
    %c0_i32 = arith.constant 0 : i32
    %c0_i32_0 = arith.constant 0 : i32
    %c0_i32_1 = arith.constant 0 : i32
    %c0_i32_2 = arith.constant 0 : i32
    return %c0_i32, %c0_i32_0, %c0_i32_1 : i32, i32, i32
  }
  func.func @transform_3(%arg0: i32) -> (i32, i32) {
    %c0_i32 = arith.constant 0 : i32
    %c0_i32_0 = arith.constant 0 : i32
    %c0_i32_1 = arith.constant 0 : i32
    return %c0_i32, %c0_i32_0 : i32, i32
  }
  func.func @transform_4(%arg0: i32) -> (i32, i32) {
    %c0_i32 = arith.constant 0 : i32
    %c0_i32_0 = arith.constant 0 : i32
    %c0_i32_1 = arith.constant 0 : i32
    return %c0_i32, %c0_i32_0 : i32, i32
  }
  func.func @transform_5(%arg0: i32) -> (i32, i32) {
    %c0_i32 = arith.constant 0 : i32
    %c0_i32_0 = arith.constant 0 : i32
    %c0_i32_1 = arith.constant 0 : i32
    return %c0_i32, %c0_i32_0 : i32, i32
  }
  func.func @transform_6(%arg0: i32) -> (i32, i32, i32, i32) {
    %c0_i32 = arith.constant 0 : i32
    %c0_i32_0 = arith.constant 0 : i32
    %c0_i32_1 = arith.constant 0 : i32
    %c0_i32_2 = arith.constant 0 : i32
    %c0_i32_3 = arith.constant 0 : i32
    return %c0_i32, %c0_i32_0, %c0_i32_1, %c0_i32_2 : i32, i32, i32, i32
  }
  func.func @transform_7(%arg0: i32) -> (i32, i32, i32, i32) {
    %c0_i32 = arith.constant 0 : i32
    %c0_i32_0 = arith.constant 0 : i32
    %c0_i32_1 = arith.constant 0 : i32
    %c0_i32_2 = arith.constant 0 : i32
    %c0_i32_3 = arith.constant 0 : i32
    return %c0_i32, %c0_i32_0, %c0_i32_1, %c0_i32_2 : i32, i32, i32, i32
  }
  func.func @transform_8(%arg0: i32) -> (i32, i32, i32) {
    %c0_i32 = arith.constant 0 : i32
    %c0_i32_0 = arith.constant 0 : i32
    %c0_i32_1 = arith.constant 0 : i32
    %c0_i32_2 = arith.constant 0 : i32
    return %c0_i32, %c0_i32_0, %c0_i32_1 : i32, i32, i32
  }
  func.func @transform_9(%arg0: i32) -> (i32, i32, i32) {
    %c0_i32 = arith.constant 0 : i32
    %c0_i32_0 = arith.constant 0 : i32
    %c0_i32_1 = arith.constant 0 : i32
    return %arg0, %c0_i32, %c0_i32_0 : i32, i32, i32
  }
}

</mosaic_0001>

<bundles_post_ra>
// kernel: tpu_custom_call.1
= control target key start
LH: loop header
LB: loop body
LE: loop exit
PB: predicated region body
PF: predicated region fallthrough
CT: control target
= control target key end

     0   :  { %s5501_s30 = smov 0   ;;  %s6309_s0 = inlined_call_operand.vmem [shape: f32[2,1,32], index: 0, kind: input, shape index: {}]   ;;  %s6310_s1 = inlined_call_operand.vmem [shape: s32[2,12,1], index: 1, kind: input, shape index: {}]   ;;  %s6311_s2 = inlined_call_operand.vmem [shape: f32[4,32,32], index: 2, kind: input, shape index: {}]   ;;  %s6312_s3 = inlined_call_operand.vmem [shape: f32[128,32], index: 3, kind: input, shape index: {}]   ;;  %s6313_s4 = inlined_call_operand.vmem [shape: f32[16,32], index: 4, kind: input, shape index: {}]   ;;  %s6314_s5 = inlined_call_operand.vmem [shape: f32[4,128], index: 5, kind: input, shape index: {}]   ;;  %s6315_s6 = inlined_call_operand.vmem [shape: f32[2,2,32,128], index: 6, kind: input, shape index: {}]   ;;  %s6316_s7 = inlined_call_operand.vmem [shape: f32[2,2,128,32], index: 7, kind: input, shape index: {}]   ;;  %s6317_s8 = inlined_call_operand.vmem [shape: f32[2,12,128], index: 8, kind: input, shape index: {}]   ;;  %s6318_s9 = inlined_call_operand.vmem [shape: f32[2,12,128], index: 9, kind: output, shape index: {}]  }
   0x1 LB: > { %s4168_s10 = sadd.s32 4294967295, %s5433_s30   ;;  %p4172_p0 = scmp.ge.s32.totalorder %s5433_s30, 1  ;;  %s5433_s30 = sphi %s5501_s30, %s19_s30  }
   0x2   : > { %p295_p1 = scmp.lt.s32.totalorder %s5433_s30, 3 }
   0x4   : > { %p296_p2 = pnand %p4172_p0, %p295_p1 }
   0x5   : > { %p334_p3 = scmp.lt.s32.totalorder (!%p296_p2), %s4168_s10, 1  ;;  %v349_v0 = vld [vmem:[%s6311_s2] sm:$0xff] (!%p296_p2)  ;;  %v350_v1 = vld [vmem:[%s6311_s2 + $0x8] sm:$0xff] (!%p296_p2)  ;;  %v351_v2 = vld [vmem:[%s6311_s2 + $0x10] sm:$0xff] (!%p296_p2)  ;;  %v5435_v3 = vmov (!%p296_p2), 0   ;;  %v5436_v4 = vmov (!%p296_p2), 0.0|0.0   ;;  %v654_v54 = vlaneseq (!%p296_p2) }
   0x6   : > { %299 = sbr.rel (%p296_p2) target bundleno = 9353 (0x2489), region = 56  ;;  %5245 = vset.pattern.permute.xlu0 (!%p296_p2), %v5435_v3  ;;  %4925 = vmatprep.subr.bf16.mxu0 (!%p296_p2), %v5436_v4  ;;  %v4926_v5 = vpack.c.bf16 (!%p296_p2), %v350_v1, %v349_v0  ;;  %v352_v6 = vld [vmem:[%s6311_s2 + $0x18] sm:$0xff] (!%p296_p2)  ;;  %vm5437_vm0 = vmmov (!%p296_p2), 0   ;;  %v5438_v7 = vmov (!%p296_p2), 0.0   ;;  %v4178_v9 = vld [vmem:[%s6311_s2 + $0x20] sm:$0xff] (!%p296_p2)  ;;  %v4179_v10 = vld [vmem:[%s6311_s2 + $0x28] sm:$0xff] (!%p296_p2) }
   0x7   : > { %4553 = vmatprep.mubr.msk.f32.mxu0 (!%p296_p2), %vm5437_vm0, %v5438_v7  ;;  %v4929_v8 = vpack.c.bf16 (!%p296_p2), %v352_v6, %v351_v2  ;;  %vm353_vm1 = vcmask (!%p296_p2), 261120   ;;  %v4932_v13 = vpack.c.bf16 (!%p296_p2), %v4179_v10, %v4178_v9  ;;  %v4180_v15 = vld [vmem:[%s6311_s2 + $0x30] sm:$0xff] (!%p296_p2)  ;;  %v4181_v16 = vld [vmem:[%s6311_s2 + $0x38] sm:$0xff] (!%p296_p2)  ;;  %v4183_v18 = vld [vmem:[%s6311_s2 + $0x40] sm:$0xff] (!%p296_p2)  ;;  %v5658_v55 = vand.u32 (!%p296_p2), 127, %v654_v54  ;;  %s5440_s26 = smov (!%p296_p2), 96  }
   0x8   : > { %4927 = vmatpush3.bf16.msra.mxu0 (!%p296_p2), %v4926_v5  ;;  %v4935_v17 = vpack.c.bf16 (!%p296_p2), %v4181_v16, %v4180_v15  ;;  %v4184_v19 = vld [vmem:[%s6311_s2 + $0x48] sm:$0xff] (!%p296_p2)  ;;  %v4185_v21 = vld [vmem:[%s6311_s2 + $0x50] sm:$0xff] (!%p296_p2)  ;;  %v4186_v22 = vld [vmem:[%s6311_s2 + $0x58] sm:$0xff] (!%p296_p2)  ;;  %v5439_v57 = vmov (!%p296_p2), 1.0   ;;  %vm776_vm4 = vcmask (!%p296_p2), 1040384   ;;  %vm778_vm5 = vcmask (!%p296_p2), 1041408  }
   0x9   : > { %4928 = vmatprep.subr.bf16.mxu0 (!%p296_p2), %v5436_v4  ;;  %v4938_v20 = vpack.c.bf16 (!%p296_p2), %v4184_v19, %v4183_v18  ;;  %v4941_v23 = vpack.c.bf16 (!%p296_p2), %v4186_v22, %v4185_v21  ;;  %v4188_v24 = vld [vmem:[%s6311_s2 + $0x60] sm:$0xff] (!%p296_p2)  ;;  %v4189_v25 = vld [vmem:[%s6311_s2 + $0x68] sm:$0xff] (!%p296_p2)  ;;  %v4190_v27 = vld [vmem:[%s6311_s2 + $0x70] sm:$0xff] (!%p296_p2)  ;;  %vm780_vm6 = vcmask (!%p296_p2), 1042432   ;;  %vm770_vm7 = vcmask (!%p296_p2), 1043456   ;;  %s5441_s27 = smov (!%p296_p2), 88  }
   0xa   : > { %v4944_v26 = vpack.c.bf16 (!%p296_p2), %v4189_v25, %v4188_v24  ;;  %v4191_v28 = vld [vmem:[%s6311_s2 + $0x78] sm:$0xff] (!%p296_p2)  ;;  %v668_v29 = vld [vmem:[%s6312_s3] sm:$0xff] (!%p296_p2)  ;;  %v669_v30 = vld [vmem:[%s6312_s3 + $0x8] sm:$0xff] (!%p296_p2)  ;;  %vm954_vm8 = vcmask (!%p296_p2), 64512   ;;  %vm1040_vm12 = vcmask (!%p296_p2), 130048   ;;  %s5442_s28 = smov (!%p296_p2), 64  }
   0xb   : > { %v4947_v31 = vpack.c.bf16 (!%p296_p2), %v4191_v28, %v4190_v27  ;;  %v5582_v32 = vpack.c.bf16 (!%p296_p2), %v669_v30, %v668_v29  ;;  %v670_v33 = vld [vmem:[%s6312_s3 + $0x10] sm:$0xff] (!%p296_p2)  ;;  %v671_v34 = vld [vmem:[%s6312_s3 + $0x18] sm:$0xff] (!%p296_p2)  ;;  %v672_v36 = vld [vmem:[%s6312_s3 + $0x20] sm:$0xff] (!%p296_p2)  ;;  %s5444_s13 = smov (!%p296_p2), 56   ;;  %s5445_s14 = smov (!%p296_p2), 112  }
   0xc   : > { %4930 = vmatpush3.bf16.msra.mxu0 (!%p296_p2), %v4929_v8  ;;  %v5591_v35 = vpack.c.bf16 (!%p296_p2), %v671_v34, %v670_v33  ;;  %v673_v37 = vld [vmem:[%s6312_s3 + $0x28] sm:$0xff] (!%p296_p2)  ;;  %v674_v39 = vld [vmem:[%s6312_s3 + $0x30] sm:$0xff] (!%p296_p2)  ;;  %v675_v40 = vld [vmem:[%s6312_s3 + $0x38] sm:$0xff] (!%p296_p2)  ;;  %s5446_s15 = smov (!%p296_p2), 104   ;;  %s5447_s16 = smov (!%p296_p2), 80  }
   0xd   : > { %s6334_s10 = smov (!%p334_p3, %s4168_s10), 1  ;;  %4931 = vmatprep.subr.bf16.mxu0 %v5436_v4  ;;  %v5602_v38 = vpack.c.bf16 %v673_v37, %v672_v36  ;;  %v5612_v41 = vpack.c.bf16 %v675_v40, %v674_v39  ;;  %v676_v42 = vld [vmem:[%s6312_s3 + $0x40] sm:$0xff]  ;;  %v677_v43 = vld [vmem:[%s6312_s3 + $0x48] sm:$0xff]  ;;  %v678_v45 = vld [vmem:[%s6312_s3 + $0x50] sm:$0xff]  ;;  %s5448_s17 = smov 72  }
   0xe   : > { %s6319_s19 = sshll.u32 %s6334_s10, 4  ;;  %s336_s22 = scalar_lea.vmem %s6309_s0, %s6334_s10  ;;  %v5622_v44 = vpack.c.bf16 %v677_v43, %v676_v42  ;;  %v679_v46 = vld [vmem:[%s6312_s3 + $0x58] sm:$0xff]  ;;  %v680_v48 = vld [vmem:[%s6312_s3 + $0x60] sm:$0xff]  ;;  %v681_v49 = vld [vmem:[%s6312_s3 + $0x68] sm:$0xff] }
   0xf   : > { %s341_s29 = scalar_lea.vmem %s6310_s1, %s6319_s19  ;;  %v348_v12 = vld [vmem:[%s336_s22] sm:$0x1]  ;;  %v5632_v47 = vpack.c.bf16 %v679_v46, %v678_v45  ;;  %v5642_v50 = vpack.c.bf16 %v681_v49, %v680_v48  ;;  %v682_v51 = vld [vmem:[%s6312_s3 + $0x70] sm:$0xff]  ;;  %v683_v52 = vld [vmem:[%s6312_s3 + $0x78] sm:$0xff]  ;;  %v5687_v48 = vshrl.u32 %v654_v54, 7  ;;  %s6321_s21 = smov 48  }
  0x10   : > { %v652_v11 = vld [vmem:[%s341_s29] sm:$0xff]  ;;  %v653_v14 = vld [vmem:[%s341_s29 + $0x8] sm:$0xf]  ;;  %4554 = vmatmul.mubr.msk.f32.vlgmr.msra.gmra.mrb[0].mxu0 %vm353_vm1, %v348_v12  ;;  %v5652_v53 = vpack.c.bf16 %v683_v52, %v682_v51  ;;  %v833_v34 = vld [vmem:[%s6315_s6 + $0x10] sm:$0xff]  ;;  %s5443_s29 = smov 120   ;;  %s6320_s22 = smov 40  }
  0x11   : > { %657 = vperm.xlu0 %5245, %v652_v11   ;;  %4933 = vmatpush3.bf16.msra.mxu0 %v4932_v13  ;;  %v783_v13 = vld [vmem:[%s6313_s4] sm:$0xff]  ;;  %v784_v16 = vld [vmem:[%s6313_s4 + $0x8] sm:$0xff]  ;;  %v834_v37 = vld [vmem:[%s6315_s6 + $0x18] sm:$0xff]  ;;  %v5690_v51 = vsub.s32 0, %v5687_v48  ;;  %vm5747_vm11 = vcmp.le.s32.totalorder %v5658_v55, %v5687_v48  ;;  %s6332_s20 = sshll.u32 %s6334_s10, 4 }
  0x12   : > { %4934 = vmatprep.subr.bf16.mxu0 %v5436_v4  ;;  %4564 = vmatprep.mubr.msk.f32.mxu0 %vm5437_vm0, %v5438_v7  ;;  %v832_v33 = vld [vmem:[%s6315_s6 + $0x8] sm:$0xff]  ;;  %v4985_v39 = vpack.c.bf16 %v834_v37, %v833_v34  ;;  %v347_v52 = vld [vmem:[%s6314_s5] sm:$0xf]  ;;  %vm5729_vm9 = vmpackc.low %vm954_vm8, %vm954_vm8 }
  0x13   : > { %vm6236_vm13 = vmpackc.low %vm353_vm1, %vm353_vm1 }
  0x15   : > { %660 = vperm.xlu0 %5245, %v653_v14   ;;  %4936 = vmatpush3.bf16.msra.mxu0 %v4935_v17 }
  0x16   : > { %4937 = vmatprep.subr.bf16.mxu0 %v5436_v4 }
  0x18   : > { %4565 = vmatmul.mubr.msk.f32.vlgmr.msra.gmra.mrb[2].mxu0 %vm353_vm1, %v348_v12 }
  0x19   : > { %4939 = vmatpush3.bf16.msra.mxu0 %v4938_v20  ;;  %4575 = vmatprep.mubr.msk.f32.mxu0 %vm5437_vm0, %v5438_v7 }
  0x1a   : > { %4940 = vmatprep.subr.bf16.mxu0 %v5436_v4 }
  0x1d   : > { %4942 = vmatpush3.bf16.msra.mxu0 %v4941_v23 }
  0x1e   : > { %4943 = vmatprep.subr.bf16.mxu0 %v5436_v4 }
  0x20   : > { %4576 = vmatmul.mubr.msk.f32.vlgmr.msra.gmra.mrb[4].mxu0 %vm353_vm1, %v348_v12 }
  0x21   : > { %4945 = vmatpush3.bf16.msra.mxu0 %v4944_v26  ;;  %4586 = vmatprep.mubr.msk.f32.mxu0 %vm5437_vm0, %v5438_v7 }
  0x22   : > { %4946 = vmatprep.subr.bf16.mxu0 %v5436_v4 }
  0x25   : > { %4948 = vmatpush3.bf16.msra.mxu0 %v4947_v31  ;;  %v831_v31 = vld [vmem:[%s6315_s6] sm:$0xff] }
  0x26   : > { %4950 = vmatprep.subr.bf16.mxu0 %v5582_v32  ;;  %v4981_v36 = vpack.c.bf16 %v832_v33, %v831_v31 }
  0x28   : > { %4587 = vmatmul.mubr.msk.f32.vlgmr.msra.gmra.mrb[6].mxu0 %vm353_vm1, %v348_v12  ;;  %4982 = vmatprep.subr.bf16.mxu1 %v4981_v36 }
  0x29   : > { %4952 = vmatpush3.bf16.msra.mxu0 %v5582_v32  ;;  %4984 = vmatpush3.bf16.msra.mxu1 %v4981_v36 }
  0x2a   : > { %4954 = vmatprep.subr.bf16.mxu0 %v5591_v35  ;;  %4986 = vmatprep.subr.bf16.mxu1 %v4985_v39 }
  0x2d   : > { %4956 = vmatpush3.bf16.msra.mxu0 %v5591_v35  ;;  %4988 = vmatpush3.bf16.msra.mxu1 %v4985_v39 }
  0x2e   : > { %4958 = vmatprep.subr.bf16.mxu0 %v5602_v38 }
  0x31   : > { %4960 = vmatpush3.bf16.msra.mxu0 %v5602_v38 }
  0x32   : > { %4962 = vmatprep.subr.bf16.mxu0 %v5612_v41 }
  0x35   : > { %4964 = vmatpush3.bf16.msra.mxu0 %v5612_v41 }
  0x36   : > { %4966 = vmatprep.subr.bf16.mxu0 %v5622_v44 }
  0x39   : > { %4968 = vmatpush3.bf16.msra.mxu0 %v5622_v44 }
  0x3a   : > { %4970 = vmatprep.subr.bf16.mxu0 %v5632_v47 }
  0x3d   : > { %4972 = vmatpush3.bf16.msra.mxu0 %v5632_v47 }
  0x3e   : > { %4974 = vmatprep.subr.bf16.mxu0 %v5642_v50 }
  0x41   : > { %4976 = vmatpush3.bf16.msra.mxu0 %v5642_v50 }
  0x42   : > { %4978 = vmatprep.subr.bf16.mxu0 %v5652_v53 }
  0x45   : > { %4980 = vmatpush3.bf16.msra.mxu0 %v5652_v53 }
  0x90   : > { %v658_v56 = vpop.permute.xlu0 %657 }
  0x91   : > { %vm662_vm2 = vcmp.eq.s32.totalorder %v658_v56, %v5658_v55  ;;  %v5696_v56 = vsub.s32 1, %v5687_v48 }
  0x92   : > { %4621 = vmatprep.mubr.msk.f32.mxu0 %vm662_vm2, %v5439_v57 }
  0x94   : > { %v661_v58 = vpop.permute.xlu0 %660 }
  0x95   : > { %vm663_vm3 = vcmp.eq.s32.totalorder %v661_v58, %v5658_v55 }
  0x96   : > { %4622 = vmatmul.mubr.msk.f32.vlgmr.msra.gmra.mrb[8].mxu0 %vm663_vm3, %v5439_v57  ;;  %v817_v57 = vrot.slane %v347_v52, %v5690_v51 }
  0xe3   : > { %v423_v59 = vpop.f32.mrb[0].mxu0 }
  0xe4   : > { %v4555_v60 = vpop.f32.mrb[1].mxu0 }
  0xe5   : > { %v823_v60 = vrot.slane %v347_v52, %v5696_v56 }
  0xeb   : > { %v498_v61 = vpop.f32.mrb[2].mxu0 }
  0xec   : > { %v760_v62 = vrot.slane %v498_v61, 7  ;;  %v4566_v63 = vpop.f32.mrb[3].mxu0 }
  0xee   : > { %v777_v0 = vsel %vm776_vm4, %v423_v59, %v760_v62 }
  0xf3   : > { %v573_v1 = vpop.f32.mrb[4].mxu0 }
  0xf4   : > { %v763_v2 = vrot.slane %v573_v1, 6  ;;  %v4577_v3 = vpop.f32.mrb[5].mxu0 }
  0xf6   : > { %v779_v4 = vsel %vm778_vm5, %v777_v0, %v763_v2  ;;  %v5711_v2 = vld [vmem:[%s6317_s8] sm:$0xff] }
  0xf7   : > { %v866_v3 = vrot.slane %v5711_v2, %v5690_v51 }
  0xfb   : > { %v648_v5 = vpop.f32.mrb[6].mxu0 }
  0xfc   : > { %v766_v6 = vrot.slane %v648_v5, 5  ;;  %v4588_v7 = vpop.f32.mrb[7].mxu0 }
  0xfe   : > { %v781_v8 = vsel %vm780_vm6, %v779_v4, %v766_v6 }
 0x169   : > { %v4623_v9 = vpop.f32.mrb[8].mxu0 }
 0x16a   : > { %v772_v10 = vrot.slane %v4623_v9, 4  ;;  %v750_v11 = vpop.f32.mrb[9].mxu0 }
 0x16b   : > { %v771_v12 = vrot.slane %v750_v11, 4 }
 0x16d   : > { %v782_v14 = vsel %vm770_vm7, %v781_v8, %v771_v12  ;;  %v773_v15 = vsel %vm770_vm7, %v771_v12, %v772_v10 }
 0x16e   : > { %v785_v17 = vadd.f32 %v783_v13, %v782_v14  ;;  %v786_v19 = vadd.f32 %v784_v16, %v773_v15  ;;  %v828_v14 = vadd.s32 8, %v5687_v48 }
 0x170   : > { %v787_v18 = vsel %vm353_vm1, %v785_v17, 0.0  ;;  %v790_v20 = vsel %vm353_vm1, %v786_v19, 0.0  ;;  %vm5741_vm10 = vcmp.le.s32.totalorder %v5658_v55, %v828_v14 }
 0x171   : > { %788 = vadd.xlane.f32.xlu1 %v787_v18 }
 0x175   : > { %791 = vadd.xlane.f32.xlu1 %v790_v20 }
 0x1fe   : > { %v789_v21 = vpop.xlane.xlu1 %788 }
 0x1ff   : > { %v794_v22 = vmul.f32 0.03125, %v789_v21 }
 0x201   : > { %v796_v23 = vsub.f32 %v785_v17, %v794_v22 }
 0x202   : > { %v792_v24 = vpop.xlane.xlu1 %791 }
 0x203   : > { %v795_v25 = vmul.f32 0.03125, %v792_v24  ;;  %v798_v26 = vmul.f32 %v796_v23, %v796_v23 }
 0x205   : > { %v797_v27 = vsub.f32 %v786_v19, %v795_v25  ;;  %v800_v28 = vsel %vm353_vm1, %v798_v26, 0.0 }
 0x206   : > { %801 = vadd.xlane.f32.xlu0 %v800_v28 }
 0x207   : > { %v799_v29 = vmul.f32 %v797_v27, %v797_v27 }
 0x209   : > { %v803_v30 = vsel %vm353_vm1, %v799_v29, 0.0 }
 0x20a   : > { %804 = vadd.xlane.f32.xlu1 %v803_v30 }
 0x293   : > { %v802_v40 = vpop.xlane.xlu0 %801 }
 0x294   : > { %v806_v42 = vmul.f32 0.03125, %v802_v40 }
 0x296   : > { %v808_v43 = vadd.f32 1e-05, %v806_v42 }
 0x297   : > { %v805_v45 = vpop.xlane.xlu1 %804 }
 0x298   : > { %5326 = vrsqrt.f32 %v808_v43  ;;  %v807_v46 = vmul.f32 0.03125, %v805_v45  ;;  %v840_v43 = vld [vmem:[%s6316_s7] sm:$0xff] }
 0x29a   : > { %v809_v49 = vadd.f32 1e-05, %v807_v46 }
 0x29c   : > { %5328 = vrsqrt.f32 %v809_v49 }
 0x2a2   : > { %v5327_v58 = vpop.eup %5326 }
 0x2a3   : > { %v812_v59 = vmul.f32 %v5327_v58, %v796_v23 }
 0x2a5   : > { %v818_v54 = vmul.f32 %v817_v57, %v812_v59 }
 0x2a6   : > { %v5329_v61 = vpop.eup %5328 }
 0x2a7   : > { %v813_v62 = vmul.f32 %v5329_v61, %v797_v27  ;;  %v5700_v63 = vadd.f32 %v823_v60, %v818_v54 }
 0x2a9   : > { %v819_v0 = vmul.f32 %v817_v57, %v813_v62  ;;  %4632 = vmatprep.mubr.msk.f32.mxu1 %vm353_vm1, %v5700_v63 }
 0x2ab   : > { %v5704_v1 = vadd.f32 %v823_v60, %v819_v0 }
 0x2ad   : > { %4633 = vmatmul.mubr.msk.f32.vlgmr.msra.gmra.mrb[0].mxu1 %vm353_vm1, %v5704_v1 }
 0x380   : > { %v4634_v4 = vpop.f32.mrb[0].mxu1 }
 0x381   : > { %v5715_v5 = vadd.f32 %v4634_v4, %v866_v3  ;;  %v939_v6 = vpop.f32.mrb[1].mxu1 }
 0x382   : > { %v5717_v7 = vadd.f32 %v939_v6, %v866_v3 }
 0x384   : > { %4639 = vmatprep.mubr.msk.f32.mxu1 %vm954_vm8, %v5717_v7  ;;  %v5723_v8 = vpack.i.bf16 %v5715_v5, %v5717_v7 }
 0x386   : > { %5247 = vrot.lane.b32.xlu1 %v5723_v8, %s5440_s26 }
 0x3f8   : > { %v5248_v9 = vpop.permute.xlu1 %5247 }
 0x3f9   : > { %v5250_v10 = vunpack.i.h.bf16 %v5248_v9  ;;  %v5249_v11 = vunpack.i.l.bf16 %v5248_v9 }
 0x3fb   : > { %v4989_v13 = vpack.c.bf16 %v5250_v10, %v5249_v11 }
 0x3fd   : > { %4991 = vmatprep.subr.msk.bf16.mxu1 %vm5729_vm9, %v4989_v13 }
 0x3fe   : > { %4994 = vmatpush3.bf16.xpose.msk.msra.mxu1 %vm5729_vm9, %v4989_v13 }
 0x405   : > { %4640 = vmatmul.mubr.msk.f32.vlgmr.msra.gmra.mrb[2].mxu1 %vm954_vm8, %v5715_v5 }
 0x4d8   : > { %v4641_v17 = vpop.f32.mrb[2].mxu1 }
 0x4d9   : > { %v1039_v18 = vsel %vm5741_vm10, %v4641_v17, -1e+09  ;;  %v1029_v19 = vpop.f32.mrb[3].mxu1 }
 0x4da   : > { %v1038_v20 = vsel %vm5747_vm11, %v1029_v19, -1e+09  ;;  %v1044_v21 = vsel %vm1040_vm12, %v1039_v18, -inf }
 0x4db   : > { %1045 = vmax.xlane.f32.xlu0 %v1044_v21  ;;  %v1041_v22 = vsel %vm1040_vm12, %v1038_v20, -inf }
 0x4dc   : > { %1042 = vmax.xlane.f32.xlu1 %v1041_v22 }
 0x4ed   : > { %5257 = vrot.lane.b32.xlu1 %v5723_v8, %s5441_s27 }
 0x568   : > { %v1046_v55 = vpop.xlane.xlu0 %1045 }
 0x569   : > { %v1048_v23 = vsub.f32 %v1039_v18, %v1046_v55  ;;  %v1043_v24 = vpop.xlane.xlu1 %1042 }
 0x56a   : > { %v1047_v25 = vsub.f32 %v1038_v20, %v1043_v24 }
 0x56b   : > { %v1051_v26 = vmul.f32 1.442695, %v1048_v23 }
 0x56c   : > { %v1049_v27 = vmul.f32 1.442695, %v1047_v25 }
 0x56d   : > { %5330 = vpow2.f32 %v1051_v26  ;;  %v5258_v42 = vpop.permute.xlu1 %5257 }
 0x56e   : > { %5332 = vpow2.f32 %v1049_v27  ;;  %v5260_v49 = vunpack.i.h.bf16 %v5258_v42  ;;  %v5259_v52 = vunpack.i.l.bf16 %v5258_v42 }
 0x570   : > { %v4999_v59 = vpack.c.bf16 %v5260_v49, %v5259_v52  ;;  %v841_v52 = vld [vmem:[%s6316_s7 + $0x8] sm:$0xff] }
 0x577   : > { %v5331_v28 = vpop.eup %5330 }
 0x578   : > { %v1056_v29 = vsel %vm1040_vm12, %v5331_v28, 0.0  ;;  %v5333_v30 = vpop.eup %5332 }
 0x579   : > { %1057 = vadd.xlane.f32.xlu0 %v1056_v29  ;;  %v1053_v31 = vsel %vm1040_vm12, %v5333_v30, 0.0 }
 0x57d   : > { %1054 = vadd.xlane.f32.xlu0 %v1053_v31 }
 0x593   : > { %5252 = vrot.lane.b32.xlu0 %v5723_v8, %s5442_s28 }
 0x597   : > { %1237 = vrot.lane.b32.xlu0 %v5717_v7, %s5443_s29 }
 0x59b   : > { %1239 = vrot.lane.b32.xlu0 %v5715_v5, %s5443_s29 }
 0x606   : > { %v1058_v33 = vpop.xlane.xlu0 %1057 }
 0x607   : > { %5334 = vrcp.f32 %v1058_v33 }
 0x60a   : > { %v1055_v34 = vpop.xlane.xlu0 %1054 }
 0x60b   : > { %5336 = vrcp.f32 %v1055_v34 }
 0x60e   : > { %v5253_v36 = vpop.permute.xlu0 %5252 }
 0x60f   : > { %v5255_v37 = vunpack.i.h.bf16 %v5253_v36  ;;  %v5254_v39 = vunpack.i.l.bf16 %v5253_v36 }
 0x611   : > { %v4995_v40 = vpack.c.bf16 %v5255_v37, %v5254_v39  ;;  %v5335_v45 = vpop.eup %5334 }
 0x612   : > { %v1062_v58 = vmul.f32 %v5335_v45, %v5331_v28  ;;  %v1238_v61 = vpop.permute.xlu0 %1237 }
 0x613   : > { %4996 = vmatprep.subr.bf16.mxu1 %v4995_v40 }
 0x614   : > { %4998 = vmatpush3.bf16.msra.mxu1 %v4995_v40 }
 0x615   : > { %v5337_v46 = vpop.eup %5336  ;;  %4649 = vmatprep.subr.mxu1 %v840_v43 }
 0x616   : > { %v1061_v57 = vmul.f32 %v5337_v46, %v5333_v30  ;;  %v1240_v62 = vpop.permute.xlu0 %1239 }
 0x618   : > { %4646 = vmatprep.mubr.msk.f32.mxu1 %vm1040_vm12, %v1061_v57 }
 0x619   : > { %4647 = vmatmul.mubr.msk.f32.vlgmr.msra.gmra.mrb[4].mxu1 %vm1040_vm12, %v1062_v58 }
 0x61a   : > { %4650 = vmatpush3.msra.mxu1 %v840_v43 }
 0x61b   : > { %5001 = vmatprep.subr.msk.bf16.mxu1 %vm5729_vm9, %v4999_v59 }
 0x6ec   : > { %v4648_v60 = vpop.f32.mrb[4].mxu1 }
 0x6ed   : > { %v1141_v54 = vpop.f32.mrb[5].mxu1 }
 0x6ee   : > { %4651 = vmatprep.mubr.msk.f32.mxu1 %vm954_vm8, %v1141_v54 }
 0x6ef   : > { %4652 = vmatmul.mubr.msk.f32.vlgmr.msra.gmra.mrb[6].mxu1 %vm954_vm8, %v4648_v60 }
 0x6f0   : > { %5004 = vmatpush3.bf16.xpose.msk.msra.mxu1 %vm5729_vm9, %v4999_v59  ;;  %4658 = vmatprep.mubr.msk.f32.mxu1 %vm954_vm8, %v1238_v61 }
 0x6f1   : > { %4668 = vmatprep.subr.mxu1 %v841_v52 }
 0x6f7   : > { %4659 = vmatmul.mubr.msk.f32.vlgmr.msra.gmra.mrb[8].mxu1 %vm954_vm8, %v1240_v62 }
 0x6f8   : > { %4669 = vmatpush3.msra.mxu1 %v841_v52 }
 0x7ca   : > { %v4660_v0 = vpop.f32.mrb[8].mxu1 }
 0x7cb   : > { %v1329_v3 = vsel %vm5741_vm10, %v4660_v0, -1e+09  ;;  %v1319_v4 = vpop.f32.mrb[9].mxu1 }
 0x7cc   : > { %v1328_v6 = vsel %vm5747_vm11, %v1319_v4, -1e+09  ;;  %v1333_v9 = vsel %vm1040_vm12, %v1329_v3, -inf }
 0x7cd   : > { %1334 = vmax.xlane.f32.xlu1 %v1333_v9  ;;  %v1330_v10 = vsel %vm1040_vm12, %v1328_v6, -inf }
 0x7ce   : > { %1331 = vmax.xlane.f32.xlu0 %v1330_v10 }
 0x7de   : > { %5262 = vrot.lane.b32.xlu1 %v5723_v8, %s5444_s13 }
 0x7e2   : > { %1522 = vrot.lane.b32.xlu1 %v5717_v7, %s5445_s14 }
 0x7e6   : > { %1524 = vrot.lane.b32.xlu1 %v5715_v5, %s5445_s14 }
 0x7ea   : > { %1807 = vrot.lane.b32.xlu1 %v5717_v7, %s5446_s15 }
 0x85a   : > { %v1335_v11 = vpop.xlane.xlu1 %1334 }
 0x85b   : > { %v1337_v13 = vsub.f32 %v1329_v3, %v1335_v11  ;;  %v1332_v14 = vpop.xlane.xlu0 %1331 }
 0x85c   : > { %v1336_v17 = vsub.f32 %v1328_v6, %v1332_v14 }
 0x85d   : > { %v1340_v18 = vmul.f32 1.442695, %v1337_v13 }
 0x85e   : > { %v1338_v19 = vmul.f32 1.442695, %v1336_v17  ;;  %v5263_v20 = vpop.permute.xlu1 %5262 }
 0x85f   : > { %5338 = vpow2.f32 %v1340_v18  ;;  %v5265_v21 = vunpack.i.h.bf16 %v5263_v20  ;;  %v5264_v22 = vunpack.i.l.bf16 %v5263_v20 }
 0x860   : > { %5340 = vpow2.f32 %v1338_v19 }
 0x861   : > { %v5005_v55 = vpack.c.bf16 %v5265_v21, %v5264_v22 }
 0x862   : > { %v1523_v37 = vpop.permute.xlu1 %1522 }
 0x863   : > { %5006 = vmatprep.subr.bf16.mxu0 %v5005_v55 }
 0x864   : > { %5008 = vmatpush3.bf16.msra.mxu0 %v5005_v55 }
 0x866   : > { %v1525_v45 = vpop.permute.xlu1 %1524 }
 0x869   : > { %v5339_v23 = vpop.eup %5338 }
 0x86a   : > { %v1345_v24 = vsel %vm1040_vm12, %v5339_v23, 0.0  ;;  %v5341_v25 = vpop.eup %5340  ;;  %v1808_v46 = vpop.permute.xlu1 %1807 }
 0x86b   : > { %1346 = vadd.xlane.f32.xlu0 %v1345_v24  ;;  %v1342_v7 = vsel %vm1040_vm12, %v5341_v25, 0.0 }
 0x86f   : > { %1343 = vadd.xlane.f32.xlu0 %v1342_v7 }
 0x885   : > { %5267 = vrot.lane.b32.xlu0 %v5723_v8, %s5447_s16 }
 0x889   : > { %5272 = vrot.lane.b32.xlu0 %v5723_v8, %s5448_s17 }
 0x88d   : > { %1809 = vrot.lane.b32.xlu0 %v5715_v5, %s5446_s15 }
 0x8f8   : > { %v1347_v26 = vpop.xlane.xlu0 %1346 }
 0x8f9   : > { %5342 = vrcp.f32 %v1347_v26 }
 0x8fc   : > { %v1344_v27 = vpop.xlane.xlu0 %1343 }
 0x8fd   : > { %5344 = vrcp.f32 %v1344_v27 }
 0x900   : > { %v5268_v28 = vpop.permute.xlu0 %5267 }
 0x901   : > { %v5270_v29 = vunpack.i.h.bf16 %v5268_v28  ;;  %v5269_v30 = vunpack.i.l.bf16 %v5268_v28 }
 0x903   : > { %v5009_v31 = vpack.c.bf16 %v5270_v29, %v5269_v30  ;;  %v5343_v34 = vpop.eup %5342 }
 0x904   : > { %v5273_v33 = vpop.permute.xlu0 %5272  ;;  %v1351_v43 = vmul.f32 %v5343_v34, %v5339_v23 }
 0x905   : > { %5011 = vmatprep.subr.msk.bf16.mxu0 %vm5729_vm9, %v5009_v31  ;;  %v5275_v39 = vunpack.i.h.bf16 %v5273_v33  ;;  %v5274_v40 = vunpack.i.l.bf16 %v5273_v33 }
 0x907   : > { %v5345_v36 = vpop.eup %5344  ;;  %v5019_v5 = vpack.c.bf16 %v5275_v39, %v5274_v40 }
 0x908   : > { %v1350_v42 = vmul.f32 %v5345_v36, %v5341_v25  ;;  %v1810_v49 = vpop.permute.xlu0 %1809 }
 0x90a   : > { %4665 = vmatprep.mubr.msk.f32.mxu0 %vm1040_vm12, %v1350_v42 }
 0x90b   : > { %4666 = vmatmul.mubr.msk.f32.vlgmr.msra.gmra.mrb[10].mxu0 %vm1040_vm12, %v1351_v43 }
 0x90c   : > { %5014 = vmatpush3.bf16.xpose.msk.msra.mxu0 %vm5729_vm9, %v5009_v31  ;;  %4677 = vmatprep.mubr.msk.f32.mxu0 %vm954_vm8, %v1523_v37 }
 0x90d   : > { %5021 = vmatprep.subr.msk.bf16.mxu0 %vm5729_vm9, %v5019_v5 }
 0x913   : > { %4678 = vmatmul.mubr.msk.f32.vlgmr.msra.gmra.mrb[12].mxu0 %vm954_vm8, %v1525_v45 }
 0x914   : > { %5024 = vmatpush3.bf16.xpose.msk.msra.mxu0 %vm5729_vm9, %v5019_v5  ;;  %4696 = vmatprep.mubr.msk.f32.mxu0 %vm954_vm8, %v1808_v46 }
 0x91b   : > { %4697 = vmatmul.mubr.msk.f32.vlgmr.msra.gmra.mrb[14].mxu0 %vm954_vm8, %v1810_v49  ;;  %v842_v49 = vld [vmem:[%s6316_s7 + $0x10] sm:$0xff] }
 0x9de   : > { %v4667_v57 = vpop.f32.mrb[10].mxu0 }
 0x9df   : > { %v1430_v58 = vpop.f32.mrb[11].mxu0 }
 0x9e0   : > { %4670 = vmatprep.mubr.msk.f32.mxu1 %vm954_vm8, %v1430_v58 }
 0x9e1   : > { %4671 = vmatmul.mubr.msk.f32.vlgmr.msra.gmra.mrb[6].mxu1 %vm954_vm8, %v4667_v57 }
 0x9e6   : > { %v4679_v59 = vpop.f32.mrb[12].mxu0 }
 0x9e7   : > { %v1614_v60 = vsel %vm5741_vm10, %v4679_v59, -1e+09  ;;  %v1604_v54 = vpop.f32.mrb[13].mxu0 }
 0x9e8   : > { %v1613_v61 = vsel %vm5747_vm11, %v1604_v54, -1e+09  ;;  %v1618_v62 = vsel %vm1040_vm12, %v1614_v60, -inf }
 0x9e9   : > { %1619 = vmax.xlane.f32.xlu0 %v1618_v62  ;;  %v1615_v0 = vsel %vm1040_vm12, %v1613_v61, -inf }
 0x9ea   : > { %1616 = vmax.xlane.f32.xlu1 %v1615_v0 }
 0x9ee   : > { %v4698_v3 = vpop.f32.mrb[14].mxu0 }
 0x9ef   : > { %v1889_v4 = vpop.f32.mrb[15].mxu0  ;;  %v1899_v55 = vsel %vm5741_vm10, %v4698_v3, -1e+09 }
 0x9f0   : > { %v1898_v20 = vsel %vm5747_vm11, %v1889_v4, -1e+09  ;;  %v1903_v23 = vsel %vm1040_vm12, %v1899_v55, -inf  ;;  %v843_v4 = vld [vmem:[%s6316_s7 + $0x18] sm:$0xff] }
 0x9f1   : > { %v1900_v22 = vsel %vm1040_vm12, %v1898_v20, -inf }
 0xa76   : > { %v1620_v6 = vpop.xlane.xlu0 %1619 }
 0xa77   : > { %v1622_v9 = vsub.f32 %v1614_v60, %v1620_v6  ;;  %v1617_v10 = vpop.xlane.xlu1 %1616 }
 0xa78   : > { %v1621_v11 = vsub.f32 %v1613_v61, %v1617_v10 }
 0xa79   : > { %v1625_v13 = vmul.f32 1.442695, %v1622_v9 }
 0xa7a   : > { %v1623_v14 = vmul.f32 1.442695, %v1621_v11  ;;  %v1234_v11 = vrot.slane %v5711_v2, %v5696_v56 }
 0xa7b   : > { %5346 = vpow2.f32 %v1625_v13 }
 0xa7c   : > { %5348 = vpow2.f32 %v1623_v14 }
 0xa85   : > { %v5347_v17 = vpop.eup %5346 }
 0xa86   : > { %v5349_v18 = vpop.eup %5348  ;;  %v1630_v19 = vsel %vm1040_vm12, %v5347_v17, 0.0 }
 0xa87   : > { %1631 = vadd.xlane.f32.xlu1 %v1630_v19  ;;  %v1627_v21 = vsel %vm1040_vm12, %v5349_v18, 0.0 }
 0xa88   : > { %1628 = vadd.xlane.f32.xlu0 %v1627_v21 }
 0xa8b   : > { %1901 = vmax.xlane.f32.xlu1 %v1900_v22 }
 0xa8f   : > { %1904 = vmax.xlane.f32.xlu1 %v1903_v23 }
 0xa9e   : > { %5277 = vrot.lane.b32.xlu0 %v5723_v8, %s6321_s21 }
 0xb14   : > { %v1632_v24 = vpop.xlane.xlu1 %1631 }
 0xb15   : > { %5350 = vrcp.f32 %v1632_v24  ;;  %v1629_v25 = vpop.xlane.xlu0 %1628 }
 0xb16   : > { %5352 = vrcp.f32 %v1629_v25 }
 0xb18   : > { %v1902_v7 = vpop.xlane.xlu1 %1901 }
 0xb19   : > { %v5278_v26 = vpop.permute.xlu0 %5277  ;;  %v1906_v29 = vsub.f32 %v1898_v20, %v1902_v7 }
 0xb1a   : > { %v5280_v27 = vunpack.i.h.bf16 %v5278_v26  ;;  %v5279_v28 = vunpack.i.l.bf16 %v5278_v26 }
 0xb1b   : > { %v1908_v36 = vmul.f32 1.442695, %v1906_v29 }
 0xb1c   : > { %v5015_v30 = vpack.c.bf16 %v5280_v27, %v5279_v28  ;;  %v1905_v31 = vpop.xlane.xlu1 %1904 }
 0xb1d   : > { %v1907_v33 = vsub.f32 %v1899_v55, %v1905_v31 }
 0xb1e   : > { %5016 = vmatprep.subr.bf16.mxu1 %v5015_v30 }
 0xb1f   : > { %v5351_v34 = vpop.eup %5350  ;;  %v1910_v37 = vmul.f32 1.442695, %v1907_v33  ;;  %5018 = vmatpush3.bf16.msra.mxu1 %v5015_v30 }
 0xb20   : > { %v5353_v39 = vpop.eup %5352  ;;  %v1636_v42 = vmul.f32 %v5351_v34, %v5347_v17  ;;  %4687 = vmatprep.subr.mxu1 %v842_v49 }
 0xb21   : > { %5354 = vpow2.f32 %v1910_v37  ;;  %v1635_v40 = vmul.f32 %v5353_v39, %v5349_v18  ;;  %v2122_v37 = vsub.s32 5, %v5687_v48  ;;  %v2128_v39 = vsub.s32 6, %v5687_v48 }
 0xb22   : > { %5356 = vpow2.f32 %v1908_v36 }
 0xb23   : > { %4684 = vmatprep.mubr.msk.f32.mxu1 %vm1040_vm12, %v1635_v40  ;;  %v2123_v40 = vrot.slane %v5711_v2, %v2122_v37 }
 0xb24   : > { %4685 = vmatmul.mubr.msk.f32.vlgmr.msra.gmra.mrb[10].mxu1 %vm1040_vm12, %v1636_v42  ;;  %v5869_v42 = vsub.s32 2, %v5687_v48 }
 0xb25   : > { %4688 = vmatpush3.msra.mxu1 %v842_v49 }
 0xb26   : > { %v2135_v49 = vrot.slane %v5711_v2, %v5869_v42 }
 0xb2b   : > { %v5355_v43 = vpop.eup %5354 }
 0xb2c   : > { %v1915_v5 = vsel %vm1040_vm12, %v5355_v43, 0.0  ;;  %v5357_v45 = vpop.eup %5356 }
 0xb2d   : > { %1916 = vadd.xlane.f32.xlu1 %v1915_v5  ;;  %v1912_v46 = vsel %vm1040_vm12, %v5357_v45, 0.0 }
 0xb31   : > { %1913 = vadd.xlane.f32.xlu1 %v1912_v46 }
 0xb42   : > { %5282 = vrot.lane.b32.xlu1 %v5723_v8, %s6320_s22 }
 0xbba   : > { %v1917_v52 = vpop.xlane.xlu1 %1916 }
 0xbbe   : > { %v1914_v57 = vpop.xlane.xlu1 %1913 }
 0xbbf   : > { %5358 = vrcp.f32 %v1914_v57 }
 0xbc0   : > { %5360 = vrcp.f32 %v1917_v52 }
 0xbc2   : > { %v5283_v58 = vpop.permute.xlu1 %5282 }
 0xbc3   : > { %v5285_v59 = vunpack.i.h.bf16 %v5283_v58  ;;  %v5284_v60 = vunpack.i.l.bf16 %v5283_v58 }
 0xbc5   : > { %v5025_v54 = vpack.c.bf16 %v5285_v59, %v5284_v60 }
 0xbc7   : > { %5026 = vmatprep.subr.bf16.mxu1 %v5025_v54 }
 0xbc9   : > { %v5359_v61 = vpop.eup %5358 }
 0xbca   : > { %v5361_v3 = vpop.eup %5360  ;;  %v1920_v8 = vmul.f32 %v5359_v61, %v5357_v45  ;;  %v2129_v45 = vrot.slane %v5711_v2, %v2128_v39 }
 0xbcb   : > { %v1921_v6 = vmul.f32 %v5361_v3, %v5355_v43 }
 0xbf7   : > { %v4686_v62 = vpop.f32.mrb[10].mxu1 }
 0xbf8   : > { %v1715_v0 = vpop.f32.mrb[11].mxu1 }
 0xbf9   : > { %4689 = vmatprep.mubr.msk.f32.mxu1 %vm954_vm8, %v1715_v0 }
 0xbfa   : > { %4690 = vmatmul.mubr.msk.f32.vlgmr.msra.gmra.mrb[6].mxu1 %vm954_vm8, %v4686_v62 }
 0xbfb   : > { %5028 = vmatpush3.bf16.msra.mxu1 %v5025_v54  ;;  %4703 = vmatprep.mubr.msk.f32.mxu1 %vm1040_vm12, %v1920_v8 }
 0xbfc   : > { %4706 = vmatprep.subr.mxu1 %v843_v4 }
 0xbfe   : > { %4704 = vmatmul.mubr.msk.f32.vlgmr.msra.gmra.mrb[12].mxu1 %vm1040_vm12, %v1921_v6 }
 0xbff   : > { %4707 = vmatpush3.msra.mxu1 %v843_v4 }
 0xcd1   : > { %v4705_v9 = vpop.f32.mrb[12].mxu1 }
 0xcd2   : > { %v2000_v10 = vpop.f32.mrb[13].mxu1 }
 0xcd3   : > { %4708 = vmatprep.mubr.msk.f32.mxu1 %vm954_vm8, %v2000_v10 }
 0xcd4   : > { %4709 = vmatmul.mubr.msk.f32.vlgmr.msra.gmra.mrb[6].mxu1 %vm954_vm8, %v4705_v9 }
 0xda7   : > { %v4710_v13 = vpop.f32.mrb[6].mxu1 }
 0xda8   : > { %v5205_v14 = vadd.f32 %v4710_v13, %v1234_v11  ;;  %v2081_v17 = vpop.f32.mrb[7].mxu1 }
 0xda9   : > { %v5206_v18 = vadd.f32 %v2081_v17, %v1234_v11 }
 0xdaa   : > { %v2093_v19 = vadd.f32 %v5205_v14, %v5704_v1 }
 0xdab   : > { %v2092_v20 = vadd.f32 %v5206_v18, %v5700_v63  ;;  %v4197_v18 = vld [vmem:[%s6315_s6 + $0x20] sm:$0xff] }
 0xdac   : > { %v2097_v21 = vsel %vm353_vm1, %v2093_v19, 0.0 }
 0xdad   : > { %2098 = vadd.xlane.f32.xlu1 %v2097_v21  ;;  %v2094_v22 = vsel %vm353_vm1, %v2092_v20, 0.0  ;;  %v4199_v21 = vld [vmem:[%s6315_s6 + $0x30] sm:$0xff] }
 0xdae   : > { %2095 = vadd.xlane.f32.xlu0 %v2094_v22  ;;  %v4200_v22 = vld [vmem:[%s6315_s6 + $0x38] sm:$0xff] }
 0xe3a   : > { %v2099_v55 = vpop.xlane.xlu1 %2098 }
 0xe3b   : > { %v2101_v23 = vmul.f32 0.03125, %v2099_v55  ;;  %v2096_v24 = vpop.xlane.xlu0 %2095  ;;  %v5033_v55 = vpack.c.bf16 %v4200_v22, %v4199_v21 }
 0xe3c   : > { %v2100_v25 = vmul.f32 0.03125, %v2096_v24 }
 0xe3d   : > { %v2103_v7 = vsub.f32 %v2093_v19, %v2101_v23  ;;  %v4198_v19 = vld [vmem:[%s6315_s6 + $0x28] sm:$0xff] }
 0xe3e   : > { %v2102_v26 = vsub.f32 %v2092_v20, %v2100_v25  ;;  %v5029_v20 = vpack.c.bf16 %v4198_v19, %v4197_v18  ;;  %v4216_v18 = vld [vmem:[%s6316_s7 + $0xf8] sm:$0xff] }
 0xe3f   : > { %v2105_v29 = vmul.f32 %v2103_v7, %v2103_v7 }
 0xe40   : > { %v2104_v27 = vmul.f32 %v2102_v26, %v2102_v26  ;;  %5030 = vmatprep.subr.bf16.mxu0 %v5029_v20 }
 0xe41   : > { %v2109_v1 = vsel %vm353_vm1, %v2105_v29, 0.0  ;;  %5032 = vmatpush3.bf16.msra.mxu0 %v5029_v20  ;;  %v5896_v29 = vld [vmem:[%s6317_s8 + $0x8] sm:$0xf]  ;;  %v2178_v20 = vsub.s32 3, %v5687_v48 }
 0xe42   : > { %v2106_v28 = vsel %vm353_vm1, %v2104_v27, 0.0  ;;  %5034 = vmatprep.subr.bf16.mxu0 %v5033_v55 }
 0xe43   : > { %2107 = vadd.xlane.f32.xlu0 %v2106_v28  ;;  %v2166_v28 = vsub.s32 7, %v5687_v48  ;;  %v2179_v21 = vrot.slane %v5711_v2, %v2178_v20 }
 0xe45   : > { %5036 = vmatpush3.bf16.msra.mxu0 %v5033_v55 }
 0xe47   : > { %2110 = vadd.xlane.f32.xlu0 %v2109_v1  ;;  %v2167_v1 = vrot.slane %v5711_v2, %v2166_v28 }
 0xed0   : > { %v2108_v63 = vpop.xlane.xlu0 %2107 }
 0xed1   : > { %v2112_v30 = vmul.f32 0.03125, %v2108_v63 }
 0xed3   : > { %v2114_v31 = vadd.f32 1e-05, %v2112_v30 }
 0xed4   : > { %v2111_v33 = vpop.xlane.xlu0 %2110 }
 0xed5   : > { %5362 = vrsqrt.f32 %v2114_v31  ;;  %v2113_v34 = vmul.f32 0.03125, %v2111_v33  ;;  %v2173_v31 = vrot.slane %v5896_v29, %v5690_v51 }
 0xed7   : > { %v2115_v36 = vadd.f32 1e-05, %v2113_v34 }
 0xed9   : > { %5364 = vrsqrt.f32 %v2115_v36 }
 0xedf   : > { %v5363_v43 = vpop.eup %5362 }
 0xee0   : > { %v2118_v5 = vmul.f32 %v5363_v43, %v2102_v26 }
 0xee2   : > { %v2124_v46 = vmul.f32 %v2123_v40, %v2118_v5 }
 0xee3   : > { %v5365_v52 = vpop.eup %5364 }
 0xee4   : > { %v2130_v57 = vadd.f32 %v2129_v45, %v2124_v46  ;;  %v2119_v58 = vmul.f32 %v5365_v52, %v2103_v7  ;;  %v4202_v46 = vld [vmem:[%s6316_s7 + $0x88] sm:$0xff]  ;;  %v4203_v52 = vld [vmem:[%s6316_s7 + $0x90] sm:$0xff] }
 0xee6   : > { %v2136_v59 = vadd.f32 %v2135_v49, %v2130_v57  ;;  %v2125_v60 = vmul.f32 %v2123_v40, %v2119_v58  ;;  %v4204_v57 = vld [vmem:[%s6316_s7 + $0x98] sm:$0xff] }
 0xee7   : > { %v5041_v58 = vpack.c.bf16 %v4204_v57, %v4203_v52 }
 0xee8   : > { %v2138_v54 = vsel %vm353_vm1, %v2136_v59, 0.0  ;;  %v2131_v61 = vadd.f32 %v2129_v45, %v2125_v60  ;;  %v4201_v45 = vld [vmem:[%s6316_s7 + $0x80] sm:$0xff]  ;;  %v4206_v60 = vld [vmem:[%s6316_s7 + $0xa8] sm:$0xff] }
 0xee9   : > { %2139 = vadd.xlane.f32.xlu0 %v2138_v54 }
 0xeea   : > { %v2137_v62 = vadd.f32 %v2135_v49, %v2131_v61  ;;  %v5037_v49 = vpack.c.bf16 %v4202_v46, %v4201_v45  ;;  %v4207_v61 = vld [vmem:[%s6316_s7 + $0xb0] sm:$0xff] }
 0xeec   : > { %v2141_v0 = vsel %vm353_vm1, %v2137_v62, 0.0  ;;  %5038 = vmatprep.subr.bf16.mxu1 %v5037_v49 }
 0xeed   : > { %2142 = vadd.xlane.f32.xlu0 %v2141_v0  ;;  %5040 = vmatpush3.bf16.msra.mxu1 %v5037_v49 }
 0xeee   : > { %5042 = vmatprep.subr.bf16.mxu1 %v5041_v58 }
 0xef1   : > { %5044 = vmatpush3.bf16.msra.mxu1 %v5041_v58 }
 0xf76   : > { %v2140_v3 = vpop.xlane.xlu0 %2139 }
 0xf77   : > { %v2144_v8 = vmul.f32 0.03125, %v2140_v3  ;;  %v4209_v3 = vld [vmem:[%s6316_s7 + $0xc0] sm:$0xff] }
 0xf79   : > { %v2146_v4 = vsub.f32 %v2136_v59, %v2144_v8  ;;  %v4205_v59 = vld [vmem:[%s6316_s7 + $0xa0] sm:$0xff]  ;;  %v4210_v8 = vld [vmem:[%s6316_s7 + $0xc8] sm:$0xff] }
 0xf7a   : > { %v2143_v6 = vpop.xlane.xlu0 %2142  ;;  %v5045_v54 = vpack.c.bf16 %v4206_v60, %v4205_v59  ;;  %v2281_v59 = vsub.s32 4, %v5687_v48 }
 0xf7b   : > { %v2145_v9 = vmul.f32 0.03125, %v2143_v6  ;;  %v2148_v10 = vmul.f32 %v2146_v4, %v2146_v4  ;;  %v5053_v6 = vpack.c.bf16 %v4210_v8, %v4209_v3 }
 0xf7c   : > { %5046 = vmatprep.subr.bf16.mxu1 %v5045_v54  ;;  %v2282_v60 = vrot.slane %v5711_v2, %v2281_v59 }
 0xf7d   : > { %v2147_v11 = vsub.f32 %v2137_v62, %v2145_v9  ;;  %v2150_v13 = vsel %vm353_vm1, %v2148_v10, 0.0  ;;  %5048 = vmatpush3.bf16.msra.mxu1 %v5045_v54  ;;  %v4208_v62 = vld [vmem:[%s6316_s7 + $0xb8] sm:$0xff] }
 0xf7e   : > { %2151 = vadd.xlane.f32.xlu0 %v2150_v13  ;;  %v5049_v0 = vpack.c.bf16 %v4208_v62, %v4207_v61  ;;  %v4212_v9 = vld [vmem:[%s6316_s7 + $0xd8] sm:$0xff]  ;;  %v4214_v13 = vld [vmem:[%s6316_s7 + $0xe8] sm:$0xff] }
 0xf7f   : > { %v2149_v14 = vmul.f32 %v2147_v11, %v2147_v11 }
 0xf80   : > { %5050 = vmatprep.subr.bf16.mxu1 %v5049_v0 }
 0xf81   : > { %v2153_v17 = vsel %vm353_vm1, %v2149_v14, 0.0  ;;  %5052 = vmatpush3.bf16.msra.mxu1 %v5049_v0 }
 0xf82   : > { %2154 = vadd.xlane.f32.xlu1 %v2153_v17  ;;  %5054 = vmatprep.subr.bf16.mxu1 %v5053_v6  ;;  %v4215_v17 = vld [vmem:[%s6316_s7 + $0xf0] sm:$0xff] }
 0xf83   : > { %v5065_v19 = vpack.c.bf16 %v4216_v18, %v4215_v17 }
 0xf85   : > { %5056 = vmatpush3.bf16.msra.mxu1 %v5053_v6 }
0x100b   : > { %v2152_v23 = vpop.xlane.xlu0 %2151 }
0x100c   : > { %v2156_v24 = vmul.f32 0.03125, %v2152_v23 }
0x100e   : > { %v2158_v25 = vadd.f32 1e-05, %v2156_v24 }
0x100f   : > { %v2155_v7 = vpop.xlane.xlu1 %2154 }
0x1010   : > { %5366 = vrsqrt.f32 %v2158_v25  ;;  %v2157_v26 = vmul.f32 0.03125, %v2155_v7 }
0x1012   : > { %v2159_v27 = vadd.f32 1e-05, %v2157_v26 }
0x1014   : > { %5368 = vrsqrt.f32 %v2159_v27 }
0x101a   : > { %v5367_v63 = vpop.eup %5366 }
0x101b   : > { %v2162_v30 = vmul.f32 %v5367_v63, %v2146_v4  ;;  %v4211_v4 = vld [vmem:[%s6316_s7 + $0xd0] sm:$0xff] }
0x101c   : > { %v5057_v10 = vpack.c.bf16 %v4212_v9, %v4211_v4 }
0x101d   : > { %v2168_v33 = vmul.f32 %v2167_v1, %v2162_v30 }
0x101e   : > { %v5369_v34 = vpop.eup %5368  ;;  %5058 = vmatprep.subr.bf16.mxu1 %v5057_v10 }
0x101f   : > { %v2163_v36 = vmul.f32 %v5369_v34, %v2147_v11  ;;  %v5903_v40 = vadd.f32 %v2173_v31, %v2168_v33  ;;  %v4213_v11 = vld [vmem:[%s6316_s7 + $0xe0] sm:$0xff]  ;;  %5060 = vmatpush3.bf16.msra.mxu1 %v5057_v10 }
0x1020   : > { %v5061_v14 = vpack.c.bf16 %v4214_v13, %v4213_v11 }
0x1021   : > { %v2169_v43 = vmul.f32 %v2167_v1, %v2163_v36  ;;  %4719 = vmatprep.mubr.msk.f32.mxu0 %vm353_vm1, %v5903_v40 }
0x1022   : > { %5062 = vmatprep.subr.bf16.mxu1 %v5061_v14 }
0x1023   : > { %v5907_v5 = vadd.f32 %v2173_v31, %v2169_v43  ;;  %5064 = vmatpush3.bf16.msra.mxu1 %v5061_v14 }
0x1024   : > { %5066 = vmatprep.subr.bf16.mxu1 %v5065_v19 }
0x1025   : > { %4720 = vmatmul.mubr.msk.f32.vlgmr.msra.gmra.mrb[16].mxu0 %vm353_vm1, %v5907_v5 }
0x1027   : > { %5068 = vmatpush3.bf16.msra.mxu1 %v5065_v19 }
0x10f8   : > { %v4721_v22 = vpop.f32.mrb[16].mxu0 }
0x10f9   : > { %v2258_v55 = vadd.f32 %v4721_v22, %v2179_v21  ;;  %v2252_v23 = vpop.f32.mrb[17].mxu0 }
0x10fa   : > { %v2253_v24 = vadd.f32 %v2252_v23, %v2179_v21  ;;  %v4254_v21 = vld [vmem:[%s6315_s6 + $0x48] sm:$0xff]  ;;  %v4256_v23 = vld [vmem:[%s6315_s6 + $0x58] sm:$0xff] }
0x10fb   : > { %v2262_v25 = vmul.f32 %v2258_v55, %v2258_v55 }
0x10fc   : > { %v2261_v7 = vmul.f32 %v2253_v24, %v2253_v24 }
0x10fd   : > { %v2264_v26 = vmul.f32 %v2262_v25, %v2258_v55 }
0x10fe   : > { %v2263_v27 = vmul.f32 %v2261_v7, %v2253_v24 }
0x10ff   : > { %v2266_v1 = vmul.f32 0.044715, %v2264_v26 }
0x1100   : > { %v2265_v63 = vmul.f32 0.044715, %v2263_v27 }
0x1101   : > { %v2268_v30 = vadd.f32 %v2266_v1, %v2258_v55 }
0x1102   : > { %v2267_v31 = vadd.f32 %v2265_v63, %v2253_v24 }
0x1103   : > { %v2270_v33 = vmul.f32 0.7978846, %v2268_v30  ;;  %v2389_v30 = vrot.slane %v5896_v29, %v5696_v56 }
0x1104   : > { %v2269_v34 = vmul.f32 0.7978846, %v2267_v31 }
0x1105   : > { %5370 = vtanh.f32 %v2270_v33 }
0x1106   : > { %5372 = vtanh.f32 %v2269_v34 }
0x110f   : > { %v5371_v36 = vpop.eup %5370 }
0x1110   : > { %v5373_v43 = vpop.eup %5372  ;;  %v2274_v45 = vadd.f32 1.0, %v5371_v36 }
0x1111   : > { %v2273_v46 = vadd.f32 1.0, %v5373_v43  ;;  %v2395_v43 = vrot.slane %v5896_v29, %v5869_v42 }
0x1112   : > { %v2276_v49 = vmul.f32 0.5, %v2274_v45 }
0x1113   : > { %v2275_v52 = vmul.f32 0.5, %v2273_v46 }
0x1114   : > { %v2278_v58 = vmul.f32 %v2276_v49, %v2258_v55  ;;  %v4255_v55 = vld [vmem:[%s6315_s6 + $0x50] sm:$0xff] }
0x1115   : > { %v2277_v57 = vmul.f32 %v2275_v52, %v2253_v24  ;;  %v5073_v24 = vpack.c.bf16 %v4256_v23, %v4255_v55 }
0x1117   : > { %4754 = vmatprep.mubr.f32.mxu1 %v2277_v57  ;;  %v6000_v57 = vld [vmem:[%s6317_s8 + $0x10] sm:$0xff] }
0x1118   : > { %4755 = vmatmul.mubr.f32.vlgmr.msra.gmra.mrb[14].mxu1 %v2278_v58  ;;  %v2436_v29 = vrot.slane %v6000_v57, %v5690_v51 }
0x11eb   : > { %v4756_v54 = vpop.f32.mrb[14].mxu1 }
0x11ec   : > { %v2355_v61 = vadd.f32 %v4756_v54, %v2282_v60  ;;  %v2349_v62 = vpop.f32.mrb[15].mxu1 }
0x11ed   : > { %v2350_v0 = vadd.f32 %v2349_v62, %v2282_v60 }
0x11ee   : > { %v2359_v3 = vadd.f32 %v2355_v61, %v5907_v5 }
0x11ef   : > { %v2358_v8 = vadd.f32 %v2350_v0, %v5903_v40  ;;  %v4253_v40 = vld [vmem:[%s6315_s6 + $0x40] sm:$0xff] }
0x11f0   : > { %v2363_v4 = vsel %vm353_vm1, %v2359_v3, 0.0  ;;  %v5069_v22 = vpack.c.bf16 %v4254_v21, %v4253_v40 }
0x11f1   : > { %2364 = vadd.xlane.f32.xlu1 %v2363_v4  ;;  %v2360_v6 = vsel %vm353_vm1, %v2358_v8, 0.0 }
0x11f2   : > { %2361 = vadd.xlane.f32.xlu0 %v2360_v6  ;;  %5070 = vmatprep.subr.bf16.mxu0 %v5069_v22 }
0x11f3   : > { %5072 = vmatpush3.bf16.msra.mxu0 %v5069_v22 }
0x11f4   : > { %5074 = vmatprep.subr.bf16.mxu0 %v5073_v24 }
0x11f7   : > { %5076 = vmatpush3.bf16.msra.mxu0 %v5073_v24 }
0x127e   : > { %v2365_v9 = vpop.xlane.xlu1 %2364 }
0x127f   : > { %v2367_v10 = vmul.f32 0.03125, %v2365_v9  ;;  %v2362_v11 = vpop.xlane.xlu0 %2361 }
0x1280   : > { %v2366_v13 = vmul.f32 0.03125, %v2362_v11 }
0x1281   : > { %v2369_v14 = vsub.f32 %v2359_v3, %v2367_v10 }
0x1282   : > { %v2368_v2 = vsub.f32 %v2358_v8, %v2366_v13 }
0x1283   : > { %v2371_v17 = vmul.f32 %v2369_v14, %v2369_v14 }
0x1284   : > { %v2370_v18 = vmul.f32 %v2368_v2, %v2368_v2 }
0x1285   : > { %v2375_v19 = vsel %vm353_vm1, %v2371_v17, 0.0 }
0x1286   : > { %2376 = vadd.xlane.f32.xlu1 %v2375_v19  ;;  %v2372_v5 = vsel %vm353_vm1, %v2370_v18, 0.0 }
0x1287   : > { %2373 = vadd.xlane.f32.xlu0 %v2372_v5 }
0x1313   : > { %v2377_v25 = vpop.xlane.xlu1 %2376 }
0x1314   : > { %v2379_v7 = vmul.f32 0.03125, %v2377_v25  ;;  %v2374_v26 = vpop.xlane.xlu0 %2373 }
0x1315   : > { %v2378_v27 = vmul.f32 0.03125, %v2374_v26 }
0x1316   : > { %v2381_v1 = vadd.f32 1e-05, %v2379_v7 }
0x1317   : > { %v2380_v63 = vadd.f32 1e-05, %v2378_v27 }
0x1318   : > { %5374 = vrsqrt.f32 %v2381_v1 }
0x1319   : > { %5376 = vrsqrt.f32 %v2380_v63 }
0x1322   : > { %v5375_v31 = vpop.eup %5374 }
0x1323   : > { %v5377_v33 = vpop.eup %5376  ;;  %v2385_v34 = vmul.f32 %v5375_v31, %v2369_v14 }
0x1324   : > { %v2384_v36 = vmul.f32 %v5377_v33, %v2368_v2 }
0x1325   : > { %v2391_v45 = vmul.f32 %v2389_v30, %v2385_v34 }
0x1326   : > { %v2390_v46 = vmul.f32 %v2389_v30, %v2384_v36  ;;  %v4261_v30 = vld [vmem:[%s6316_s7 + $0x100] sm:$0xff] }
0x1327   : > { %v5991_v52 = vadd.f32 %v2395_v43, %v2391_v45 }
0x1328   : > { %v5989_v49 = vadd.f32 %v2395_v43, %v2390_v46 }
0x132a   : > { %4765 = vmatprep.mubr.msk.f32.mxu0 %vm353_vm1, %v5989_v49 }
0x132b   : > { %4766 = vmatmul.mubr.msk.f32.vlgmr.msra.gmra.mrb[18].mxu0 %vm353_vm1, %v5991_v52 }
0x13fe   : > { %v4767_v58 = vpop.f32.mrb[18].mxu0 }
0x13ff   : > { %v6004_v60 = vadd.f32 %v4767_v58, %v2436_v29  ;;  %v2509_v54 = vpop.f32.mrb[19].mxu0 }
0x1400   : > { %v6006_v61 = vadd.f32 %v2509_v54, %v2436_v29 }
0x1402   : > { %4772 = vmatprep.mubr.msk.f32.mxu0 %vm954_vm8, %v6006_v61  ;;  %v6012_v62 = vpack.i.bf16 %v6004_v60, %v6006_v61 }
0x1404   : > { %5287 = vrot.lane.b32.xlu0 %v6012_v62, %s5440_s26  ;;  %s346_s26 = scalar_lea.vmem %s6318_s9, %s6332_s20 }
0x1408   : > { %5297 = vrot.lane.b32.xlu0 %v6012_v62, %s5441_s27 }
0x140c   : > { %2805 = vrot.lane.b32.xlu0 %v6006_v61, %s5443_s29 }
0x1410   : > { %2807 = vrot.lane.b32.xlu0 %v6004_v60, %s5443_s29 }
0x1476   : > { %v5288_v0 = vpop.permute.xlu0 %5287 }
0x1477   : > { %v5290_v3 = vunpack.i.h.bf16 %v5288_v0  ;;  %v5289_v8 = vunpack.i.l.bf16 %v5288_v0 }
0x1479   : > { %v5077_v4 = vpack.c.bf16 %v5290_v3, %v5289_v8 }
0x147a   : > { %v5298_v63 = vpop.permute.xlu0 %5297 }
0x147b   : > { %5079 = vmatprep.subr.msk.bf16.mxu0 %vm5729_vm9, %v5077_v4  ;;  %v5300_v34 = vunpack.i.h.bf16 %v5298_v63  ;;  %v5299_v36 = vunpack.i.l.bf16 %v5298_v63 }
0x147c   : > { %5082 = vmatpush3.bf16.xpose.msk.msra.mxu0 %vm5729_vm9, %v5077_v4 }
0x147d   : > { %v5087_v46 = vpack.c.bf16 %v5300_v34, %v5299_v36 }
0x147e   : > { %v2806_v54 = vpop.permute.xlu0 %2805 }
0x1482   : > { %v2808_v0 = vpop.permute.xlu0 %2807 }
0x1483   : > { %4773 = vmatmul.mubr.msk.f32.vlgmr.msra.gmra.mrb[20].mxu0 %vm954_vm8, %v6004_v60 }
0x1556   : > { %v4774_v6 = vpop.f32.mrb[20].mxu0 }
0x1557   : > { %v2598_v9 = vpop.f32.mrb[21].mxu0  ;;  %v2608_v13 = vsel %vm5741_vm10, %v4774_v6, -1e+09 }
0x1558   : > { %v2607_v10 = vsel %vm5747_vm11, %v2598_v9, -1e+09  ;;  %v2612_v14 = vsel %vm1040_vm12, %v2608_v13, -inf }
0x1559   : > { %v2609_v11 = vsel %vm1040_vm12, %v2607_v10, -inf }
0x155a   : > { %2610 = vmax.xlane.f32.xlu1 %v2609_v11 }
0x155e   : > { %2613 = vmax.xlane.f32.xlu1 %v2612_v14 }
0x15e7   : > { %v2611_v2 = vpop.xlane.xlu1 %2610 }
0x15e8   : > { %v2615_v17 = vsub.f32 %v2607_v10, %v2611_v2 }
0x15ea   : > { %v2617_v5 = vmul.f32 1.442695, %v2615_v17 }
0x15eb   : > { %v2614_v18 = vpop.xlane.xlu1 %2613 }
0x15ec   : > { %v2616_v19 = vsub.f32 %v2608_v13, %v2614_v18 }
0x15ee   : > { %v2619_v40 = vmul.f32 1.442695, %v2616_v19 }
0x15f0   : > { %5378 = vpow2.f32 %v2619_v40 }
0x15f1   : > { %5380 = vpow2.f32 %v2617_v5 }
0x15fa   : > { %v5379_v21 = vpop.eup %5378 }
0x15fb   : > { %v2624_v22 = vsel %vm1040_vm12, %v5379_v21, 0.0  ;;  %v5381_v55 = vpop.eup %5380 }
0x15fc   : > { %2625 = vadd.xlane.f32.xlu1 %v2624_v22  ;;  %v2621_v23 = vsel %vm1040_vm12, %v5381_v55, 0.0 }
0x1600   : > { %2622 = vadd.xlane.f32.xlu1 %v2621_v23 }
0x1611   : > { %5292 = vrot.lane.b32.xlu1 %v6012_v62, %s5442_s28 }
0x1689   : > { %v2626_v24 = vpop.xlane.xlu1 %2625 }
0x168a   : > { %5382 = vrcp.f32 %v2626_v24 }
0x168d   : > { %v2623_v25 = vpop.xlane.xlu1 %2622 }
0x168e   : > { %5384 = vrcp.f32 %v2623_v25 }
0x1691   : > { %v5293_v7 = vpop.permute.xlu1 %5292 }
0x1692   : > { %v5295_v26 = vunpack.i.h.bf16 %v5293_v7  ;;  %v5294_v27 = vunpack.i.l.bf16 %v5293_v7 }
0x1694   : > { %v5083_v1 = vpack.c.bf16 %v5295_v26, %v5294_v27  ;;  %v5383_v31 = vpop.eup %5382 }
0x1695   : > { %v2630_v45 = vmul.f32 %v5383_v31, %v5379_v21 }
0x1696   : > { %5084 = vmatprep.subr.bf16.mxu0 %v5083_v1 }
0x1697   : > { %5086 = vmatpush3.bf16.msra.mxu0 %v5083_v1 }
0x1698   : > { %v5385_v33 = vpop.eup %5384  ;;  %4782 = vmatprep.subr.mxu0 %v4261_v30 }
0x1699   : > { %v2629_v43 = vmul.f32 %v5385_v33, %v5381_v55 }
0x169b   : > { %4779 = vmatprep.mubr.msk.f32.mxu0 %vm1040_vm12, %v2629_v43 }
0x169c   : > { %4780 = vmatmul.mubr.msk.f32.vlgmr.msra.gmra.mrb[22].mxu0 %vm1040_vm12, %v2630_v45 }
0x169d   : > { %4783 = vmatpush3.msra.mxu0 %v4261_v30 }
0x169e   : > { %5089 = vmatprep.subr.msk.bf16.mxu0 %vm5729_vm9, %v5087_v46 }
0x176f   : > { %v4781_v29 = vpop.f32.mrb[22].mxu0 }
0x1770   : > { %v2709_v58 = vpop.f32.mrb[23].mxu0 }
0x1771   : > { %4784 = vmatprep.mubr.msk.f32.mxu0 %vm954_vm8, %v2709_v58 }
0x1772   : > { %4785 = vmatmul.mubr.msk.f32.vlgmr.msra.gmra.mrb[24].mxu0 %vm954_vm8, %v4781_v29 }
0x1773   : > { %5092 = vmatpush3.bf16.xpose.msk.msra.mxu0 %vm5729_vm9, %v5087_v46  ;;  %4791 = vmatprep.mubr.msk.f32.mxu0 %vm954_vm8, %v2806_v54  ;;  %v4262_v54 = vld [vmem:[%s6316_s7 + $0x108] sm:$0xff] }
0x1774   : > { %4801 = vmatprep.subr.mxu0 %v4262_v54 }
0x177a   : > { %4792 = vmatmul.mubr.msk.f32.vlgmr.msra.gmra.mrb[26].mxu0 %vm954_vm8, %v2808_v0 }
0x177b   : > { %4802 = vmatpush3.msra.mxu0 %v4262_v54 }
0x184d   : > { %v4793_v3 = vpop.f32.mrb[26].mxu0 }
0x184e   : > { %v2897_v8 = vsel %vm5741_vm10, %v4793_v3, -1e+09  ;;  %v2887_v4 = vpop.f32.mrb[27].mxu0 }
0x184f   : > { %v2896_v6 = vsel %vm5747_vm11, %v2887_v4, -1e+09  ;;  %v2901_v9 = vsel %vm1040_vm12, %v2897_v8, -inf }
0x1850   : > { %2902 = vmax.xlane.f32.xlu1 %v2901_v9  ;;  %v2898_v10 = vsel %vm1040_vm12, %v2896_v6, -inf }
0x1851   : > { %2899 = vmax.xlane.f32.xlu0 %v2898_v10 }
0x1861   : > { %5302 = vrot.lane.b32.xlu1 %v6012_v62, %s5444_s13  ;;  %s6328_s13 = smov 48  }
0x1865   : > { %3090 = vrot.lane.b32.xlu1 %v6006_v61, %s5445_s14 }
0x1869   : > { %3092 = vrot.lane.b32.xlu1 %v6004_v60, %s5445_s14  ;;  %s6329_s14 = smov 40  }
0x186d   : > { %3375 = vrot.lane.b32.xlu1 %v6006_v61, %s5446_s15 }
0x18dd   : > { %v2903_v11 = vpop.xlane.xlu1 %2902 }
0x18de   : > { %v2905_v13 = vsub.f32 %v2897_v8, %v2903_v11  ;;  %v2900_v14 = vpop.xlane.xlu0 %2899 }
0x18df   : > { %v2904_v2 = vsub.f32 %v2896_v6, %v2900_v14 }
0x18e0   : > { %v2908_v17 = vmul.f32 1.442695, %v2905_v13 }
0x18e1   : > { %v2906_v18 = vmul.f32 1.442695, %v2904_v2  ;;  %v5303_v19 = vpop.permute.xlu1 %5302 }
0x18e2   : > { %5386 = vpow2.f32 %v2908_v17  ;;  %v5305_v5 = vunpack.i.h.bf16 %v5303_v19  ;;  %v5304_v40 = vunpack.i.l.bf16 %v5303_v19 }
0x18e3   : > { %5388 = vpow2.f32 %v2906_v18 }
0x18e4   : > { %v5093_v21 = vpack.c.bf16 %v5305_v5, %v5304_v40 }
0x18e5   : > { %v3091_v33 = vpop.permute.xlu1 %3090 }
0x18e6   : > { %5094 = vmatprep.subr.bf16.mxu1 %v5093_v21 }
0x18e7   : > { %5096 = vmatpush3.bf16.msra.mxu1 %v5093_v21 }
0x18e9   : > { %v3093_v46 = vpop.permute.xlu1 %3092 }
0x18ec   : > { %v5387_v22 = vpop.eup %5386 }
0x18ed   : > { %v2913_v55 = vsel %vm1040_vm12, %v5387_v22, 0.0  ;;  %v5389_v23 = vpop.eup %5388  ;;  %v3376_v29 = vpop.permute.xlu1 %3375 }
0x18ee   : > { %2914 = vadd.xlane.f32.xlu0 %v2913_v55  ;;  %v2910_v61 = vsel %vm1040_vm12, %v5389_v23, 0.0 }
0x18f2   : > { %2911 = vadd.xlane.f32.xlu0 %v2910_v61 }
0x1908   : > { %5307 = vrot.lane.b32.xlu0 %v6012_v62, %s5447_s16 }
0x190c   : > { %5312 = vrot.lane.b32.xlu0 %v6012_v62, %s5448_s17 }
0x1910   : > { %3377 = vrot.lane.b32.xlu0 %v6004_v60, %s5446_s15 }
0x197b   : > { %v2915_v24 = vpop.xlane.xlu0 %2914 }
0x197c   : > { %5390 = vrcp.f32 %v2915_v24 }
0x197f   : > { %v2912_v25 = vpop.xlane.xlu0 %2911 }
0x1980   : > { %5392 = vrcp.f32 %v2912_v25 }
0x1983   : > { %v5308_v7 = vpop.permute.xlu0 %5307 }
0x1984   : > { %v5310_v26 = vunpack.i.h.bf16 %v5308_v7  ;;  %v5309_v27 = vunpack.i.l.bf16 %v5308_v7 }
0x1986   : > { %v5097_v1 = vpack.c.bf16 %v5310_v26, %v5309_v27  ;;  %v5391_v30 = vpop.eup %5390 }
0x1987   : > { %v5313_v63 = vpop.permute.xlu0 %5312  ;;  %v2919_v45 = vmul.f32 %v5391_v30, %v5387_v22 }
0x1988   : > { %5099 = vmatprep.subr.msk.bf16.mxu1 %vm5729_vm9, %v5097_v1  ;;  %v5315_v34 = vunpack.i.h.bf16 %v5313_v63  ;;  %v5314_v36 = vunpack.i.l.bf16 %v5313_v63 }
0x198a   : > { %v5393_v31 = vpop.eup %5392  ;;  %v5107_v60 = vpack.c.bf16 %v5315_v34, %v5314_v36 }
0x198b   : > { %v2918_v43 = vmul.f32 %v5393_v31, %v5389_v23  ;;  %v3378_v58 = vpop.permute.xlu0 %3377 }
0x198d   : > { %4798 = vmatprep.mubr.msk.f32.mxu1 %vm1040_vm12, %v2918_v43 }
0x198e   : > { %4799 = vmatmul.mubr.msk.f32.vlgmr.msra.gmra.mrb[16].mxu1 %vm1040_vm12, %v2919_v45 }
0x198f   : > { %5102 = vmatpush3.bf16.xpose.msk.msra.mxu1 %vm5729_vm9, %v5097_v1  ;;  %4810 = vmatprep.mubr.msk.f32.mxu1 %vm954_vm8, %v3091_v33 }
0x1990   : > { %5109 = vmatprep.subr.msk.bf16.mxu1 %vm5729_vm9, %v5107_v60 }
0x1996   : > { %4811 = vmatmul.mubr.msk.f32.vlgmr.msra.gmra.mrb[18].mxu1 %vm954_vm8, %v3093_v46 }
0x1997   : > { %5112 = vmatpush3.bf16.xpose.msk.msra.mxu1 %vm5729_vm9, %v5107_v60  ;;  %4829 = vmatprep.mubr.msk.f32.mxu1 %vm954_vm8, %v3376_v29 }
0x199e   : > { %4830 = vmatmul.mubr.msk.f32.vlgmr.msra.gmra.mrb[20].mxu1 %vm954_vm8, %v3378_v58 }
0x1a61   : > { %v4800_v0 = vpop.f32.mrb[16].mxu1 }
0x1a62   : > { %v2998_v3 = vpop.f32.mrb[17].mxu1 }
0x1a63   : > { %4803 = vmatprep.mubr.msk.f32.mxu0 %vm954_vm8, %v2998_v3  ;;  %v4263_v3 = vld [vmem:[%s6316_s7 + $0x110] sm:$0xff] }
0x1a64   : > { %4804 = vmatmul.mubr.msk.f32.vlgmr.msra.gmra.mrb[24].mxu0 %vm954_vm8, %v4800_v0 }
0x1a69   : > { %v4812_v8 = vpop.f32.mrb[18].mxu1 }
0x1a6a   : > { %v3182_v12 = vsel %vm5741_vm10, %v4812_v8, -1e+09  ;;  %v3172_v4 = vpop.f32.mrb[19].mxu1 }
0x1a6b   : > { %v3181_v6 = vsel %vm5747_vm11, %v3172_v4, -1e+09  ;;  %v3186_v9 = vsel %vm1040_vm12, %v3182_v12, -inf }
0x1a6c   : > { %3187 = vmax.xlane.f32.xlu0 %v3186_v9  ;;  %v3183_v10 = vsel %vm1040_vm12, %v3181_v6, -inf }
0x1a6d   : > { %3184 = vmax.xlane.f32.xlu1 %v3183_v10 }
0x1a71   : > { %v4831_v11 = vpop.f32.mrb[20].mxu1 }
0x1a72   : > { %v3457_v13 = vpop.f32.mrb[21].mxu1  ;;  %v3467_v24 = vsel %vm5741_vm10, %v4831_v11, -1e+09 }
0x1a73   : > { %v3466_v55 = vsel %vm5747_vm11, %v3457_v13, -1e+09  ;;  %v3471_v25 = vsel %vm1040_vm12, %v3467_v24, -inf }
0x1a74   : > { %v3468_v61 = vsel %vm1040_vm12, %v3466_v55, -inf }
0x1af9   : > { %v3188_v14 = vpop.xlane.xlu0 %3187 }
0x1afa   : > { %v3190_v2 = vsub.f32 %v3182_v12, %v3188_v14  ;;  %v3185_v17 = vpop.xlane.xlu1 %3184 }
0x1afb   : > { %v3189_v18 = vsub.f32 %v3181_v6, %v3185_v17  ;;  %v4264_v17 = vld [vmem:[%s6316_s7 + $0x118] sm:$0xff] }
0x1afc   : > { %v3193_v19 = vmul.f32 1.442695, %v3190_v2 }
0x1afd   : > { %v3191_v5 = vmul.f32 1.442695, %v3189_v18 }
0x1afe   : > { %5394 = vpow2.f32 %v3193_v19 }
0x1aff   : > { %5396 = vpow2.f32 %v3191_v5 }
0x1b08   : > { %v5395_v40 = vpop.eup %5394 }
0x1b09   : > { %v5397_v21 = vpop.eup %5396  ;;  %v3198_v22 = vsel %vm1040_vm12, %v5395_v40, 0.0 }
0x1b0a   : > { %3199 = vadd.xlane.f32.xlu1 %v3198_v22  ;;  %v3195_v23 = vsel %vm1040_vm12, %v5397_v21, 0.0 }
0x1b0b   : > { %3196 = vadd.xlane.f32.xlu0 %v3195_v23 }
0x1b0e   : > { %3469 = vmax.xlane.f32.xlu1 %v3468_v61 }
0x1b12   : > { %3472 = vmax.xlane.f32.xlu1 %v3471_v25 }
0x1b21   : > { %5317 = vrot.lane.b32.xlu0 %v6012_v62, %s6328_s13 }
0x1b97   : > { %v3200_v7 = vpop.xlane.xlu1 %3199 }
0x1b98   : > { %5398 = vrcp.f32 %v3200_v7  ;;  %v3197_v16 = vpop.xlane.xlu0 %3196 }
0x1b99   : > { %5400 = vrcp.f32 %v3197_v16 }
0x1b9b   : > { %v3470_v26 = vpop.xlane.xlu1 %3469 }
0x1b9c   : > { %v5318_v27 = vpop.permute.xlu0 %5317  ;;  %v3474_v30 = vsub.f32 %v3466_v55, %v3470_v26 }
0x1b9d   : > { %v5320_v1 = vunpack.i.h.bf16 %v5318_v27  ;;  %v5319_v63 = vunpack.i.l.bf16 %v5318_v27 }
0x1b9e   : > { %v3476_v36 = vmul.f32 1.442695, %v3474_v30 }
0x1b9f   : > { %v5103_v31 = vpack.c.bf16 %v5320_v1, %v5319_v63  ;;  %v3473_v33 = vpop.xlane.xlu1 %3472 }
0x1ba0   : > { %v3475_v15 = vsub.f32 %v3467_v24, %v3473_v33 }
0x1ba1   : > { %5104 = vmatprep.subr.bf16.mxu0 %v5103_v31 }
0x1ba2   : > { %v5399_v34 = vpop.eup %5398  ;;  %v3478_v43 = vmul.f32 1.442695, %v3475_v15  ;;  %5106 = vmatpush3.bf16.msra.mxu0 %v5103_v31 }
0x1ba3   : > { %v5401_v45 = vpop.eup %5400  ;;  %v3204_v46 = vmul.f32 %v5399_v34, %v5395_v40  ;;  %4820 = vmatprep.subr.mxu0 %v4263_v3  ;;  %v2802_v40 = vrot.slane %v6000_v57, %v5696_v56 }
0x1ba4   : > { %5402 = vpow2.f32 %v3478_v43  ;;  %v3203_v60 = vmul.f32 %v5401_v45, %v5397_v21 }
0x1ba5   : > { %5404 = vpow2.f32 %v3476_v36 }
0x1ba6   : > { %4817 = vmatprep.mubr.msk.f32.mxu0 %vm1040_vm12, %v3203_v60 }
0x1ba7   : > { %4818 = vmatmul.mubr.msk.f32.vlgmr.msra.gmra.mrb[28].mxu0 %vm1040_vm12, %v3204_v46  ;;  %v3691_v46 = vrot.slane %v6000_v57, %v2122_v37 }
0x1ba8   : > { %4821 = vmatpush3.msra.mxu0 %v4263_v3  ;;  %v3703_v3 = vrot.slane %v6000_v57, %v5869_v42 }
0x1bae   : > { %v5403_v29 = vpop.eup %5402 }
0x1baf   : > { %v3483_v58 = vsel %vm1040_vm12, %v5403_v29, 0.0  ;;  %v5405_v54 = vpop.eup %5404 }
0x1bb0   : > { %3484 = vadd.xlane.f32.xlu1 %v3483_v58  ;;  %v3480_v0 = vsel %vm1040_vm12, %v5405_v54, 0.0 }
0x1bb4   : > { %3481 = vadd.xlane.f32.xlu1 %v3480_v0 }
0x1bc5   : > { %5322 = vrot.lane.b32.xlu1 %v6012_v62, %s6329_s14 }
0x1c3d   : > { %v3485_v8 = vpop.xlane.xlu1 %3484 }
0x1c41   : > { %v3482_v12 = vpop.xlane.xlu1 %3481 }
0x1c42   : > { %5406 = vrcp.f32 %v3482_v12 }
0x1c43   : > { %5408 = vrcp.f32 %v3485_v8 }
0x1c45   : > { %v5323_v4 = vpop.permute.xlu1 %5322 }
0x1c46   : > { %v5325_v6 = vunpack.i.h.bf16 %v5323_v4  ;;  %v5324_v9 = vunpack.i.l.bf16 %v5323_v4 }
0x1c48   : > { %v5113_v10 = vpack.c.bf16 %v5325_v6, %v5324_v9 }
0x1c4a   : > { %5114 = vmatprep.subr.bf16.mxu0 %v5113_v10 }
0x1c4c   : > { %v5407_v11 = vpop.eup %5406 }
0x1c4d   : > { %v5409_v2 = vpop.eup %5408  ;;  %v3488_v62 = vmul.f32 %v5407_v11, %v5405_v54  ;;  %v3697_v54 = vrot.slane %v6000_v57, %v2128_v39 }
0x1c4e   : > { %v3489_v18 = vmul.f32 %v5409_v2, %v5403_v29 }
0x1c7a   : > { %v4819_v13 = vpop.f32.mrb[28].mxu0 }
0x1c7b   : > { %v3283_v14 = vpop.f32.mrb[29].mxu0 }
0x1c7c   : > { %4822 = vmatprep.mubr.msk.f32.mxu0 %vm954_vm8, %v3283_v14 }
0x1c7d   : > { %4823 = vmatmul.mubr.msk.f32.vlgmr.msra.gmra.mrb[24].mxu0 %vm954_vm8, %v4819_v13 }
0x1c7e   : > { %5116 = vmatpush3.bf16.msra.mxu0 %v5113_v10  ;;  %4836 = vmatprep.mubr.msk.f32.mxu0 %vm1040_vm12, %v3488_v62 }
0x1c7f   : > { %4839 = vmatprep.subr.mxu0 %v4264_v17 }
0x1c81   : > { %4837 = vmatmul.mubr.msk.f32.vlgmr.msra.gmra.mrb[30].mxu0 %vm1040_vm12, %v3489_v18 }
0x1c82   : > { %4840 = vmatpush3.msra.mxu0 %v4264_v17 }
0x1d54   : > { %v4838_v19 = vpop.f32.mrb[30].mxu0 }
0x1d55   : > { %v3568_v5 = vpop.f32.mrb[31].mxu0 }
0x1d56   : > { %4841 = vmatprep.mubr.msk.f32.mxu0 %vm954_vm8, %v3568_v5 }
0x1d57   : > { %4842 = vmatmul.mubr.msk.f32.vlgmr.msra.gmra.mrb[24].mxu0 %vm954_vm8, %v4838_v19 }
0x1e2a   : > { %v4843_v21 = vpop.f32.mrb[24].mxu0 }
0x1e2b   : > { %v5207_v22 = vadd.f32 %v4843_v21, %v2802_v40  ;;  %v3649_v55 = vpop.f32.mrb[25].mxu0 }
0x1e2c   : > { %v5208_v23 = vadd.f32 %v3649_v55, %v2802_v40  ;;  %v4258_v55 = vld [vmem:[%s6315_s6 + $0x68] sm:$0xff] }
0x1e2d   : > { %v3661_v61 = vadd.f32 %v5207_v22, %v5991_v52  ;;  %v4257_v22 = vld [vmem:[%s6315_s6 + $0x60] sm:$0xff] }
0x1e2e   : > { %v3660_v24 = vadd.f32 %v5208_v23, %v5989_v49  ;;  %v5117_v23 = vpack.c.bf16 %v4258_v55, %v4257_v22 }
0x1e2f   : > { %v3665_v25 = vsel %vm353_vm1, %v3661_v61, 0.0 }
0x1e30   : > { %3666 = vadd.xlane.f32.xlu1 %v3665_v25  ;;  %v3662_v7 = vsel %vm353_vm1, %v3660_v24, 0.0  ;;  %5118 = vmatprep.subr.bf16.mxu1 %v5117_v23 }
0x1e31   : > { %3663 = vadd.xlane.f32.xlu0 %v3662_v7  ;;  %5120 = vmatpush3.bf16.msra.mxu1 %v5117_v23 }
0x1ebd   : > { %v3667_v16 = vpop.xlane.xlu1 %3666 }
0x1ebe   : > { %v3669_v26 = vmul.f32 0.03125, %v3667_v16  ;;  %v3664_v27 = vpop.xlane.xlu0 %3663 }
0x1ebf   : > { %v3668_v1 = vmul.f32 0.03125, %v3664_v27 }
0x1ec0   : > { %v3671_v63 = vsub.f32 %v3661_v61, %v3669_v26  ;;  %v4259_v61 = vld [vmem:[%s6315_s6 + $0x70] sm:$0xff] }
0x1ec1   : > { %v3670_v30 = vsub.f32 %v3660_v24, %v3668_v1  ;;  %v4260_v24 = vld [vmem:[%s6315_s6 + $0x78] sm:$0xff] }
0x1ec2   : > { %v3673_v15 = vmul.f32 %v3671_v63, %v3671_v63  ;;  %v5121_v25 = vpack.c.bf16 %v4260_v24, %v4259_v61 }
0x1ec3   : > { %v3672_v31 = vmul.f32 %v3670_v30, %v3670_v30 }
0x1ec4   : > { %v3677_v52 = vsel %vm353_vm1, %v3673_v15, 0.0  ;;  %5122 = vmatprep.subr.bf16.mxu1 %v5121_v25 }
0x1ec5   : > { %v3674_v33 = vsel %vm353_vm1, %v3672_v31, 0.0  ;;  %5124 = vmatpush3.bf16.msra.mxu1 %v5121_v25  ;;  %v3735_v31 = vrot.slane %v6000_v57, %v2166_v28  ;;  %v4265_v28 = vld [vmem:[%s6316_s7 + $0x180] sm:$0xff] }
0x1ec6   : > { %3675 = vadd.xlane.f32.xlu0 %v3674_v33  ;;  %5159 = vmatprep.subr.msk.bf16.mxu1 %vm6236_vm13, %v5582_v32 }
0x1eca   : > { %3678 = vadd.xlane.f32.xlu0 %v3677_v52 }
0x1f53   : > { %v3676_v49 = vpop.xlane.xlu0 %3675 }
0x1f54   : > { %v3680_v34 = vmul.f32 0.03125, %v3676_v49 }
0x1f56   : > { %v3682_v36 = vadd.f32 1e-05, %v3680_v34 }
0x1f57   : > { %v3679_v43 = vpop.xlane.xlu0 %3678 }
0x1f58   : > { %5410 = vrsqrt.f32 %v3682_v36  ;;  %v3681_v45 = vmul.f32 0.03125, %v3679_v43 }
0x1f5a   : > { %v3683_v60 = vadd.f32 1e-05, %v3681_v45 }
0x1f5c   : > { %5412 = vrsqrt.f32 %v3683_v60 }
0x1f62   : > { %v5411_v29 = vpop.eup %5410 }
0x1f63   : > { %v3686_v58 = vmul.f32 %v5411_v29, %v3670_v30  ;;  %v6161_v30 = vld [vmem:[%s6317_s8 + $0x18] sm:$0xf]  ;;  %v4267_v29 = vld [vmem:[%s6316_s7 + $0x190] sm:$0xff] }
0x1f64   : > { %v3741_v52 = vrot.slane %v6161_v30, %v5690_v51  ;;  %v4266_v51 = vld [vmem:[%s6316_s7 + $0x188] sm:$0xff] }
0x1f65   : > { %v3692_v0 = vmul.f32 %v3691_v46, %v3686_v58  ;;  %v4268_v58 = vld [vmem:[%s6316_s7 + $0x198] sm:$0xff] }
0x1f66   : > { %v5413_v8 = vpop.eup %5412 }
0x1f67   : > { %v3698_v12 = vadd.f32 %v3697_v54, %v3692_v0  ;;  %v3687_v4 = vmul.f32 %v5413_v8, %v3671_v63  ;;  %v4269_v0 = vld [vmem:[%s6316_s7 + $0x1a0] sm:$0xff] }
0x1f69   : > { %v3704_v6 = vadd.f32 %v3703_v3, %v3698_v12  ;;  %v3693_v9 = vmul.f32 %v3691_v46, %v3687_v4  ;;  %v5125_v46 = vpack.c.bf16 %v4266_v51, %v4265_v28  ;;  %v4271_v12 = vld [vmem:[%s6316_s7 + $0x1b0] sm:$0xff]  ;;  %v4272_v4 = vld [vmem:[%s6316_s7 + $0x1b8] sm:$0xff] }
0x1f6b   : > { %v3706_v10 = vsel %vm353_vm1, %v3704_v6, 0.0  ;;  %v3699_v11 = vadd.f32 %v3697_v54, %v3693_v9  ;;  %5126 = vmatprep.subr.bf16.mxu0 %v5125_v46  ;;  %v5129_v54 = vpack.c.bf16 %v4268_v58, %v4267_v29  ;;  %v4273_v9 = vld [vmem:[%s6316_s7 + $0x1c0] sm:$0xff] }
0x1f6c   : > { %3707 = vadd.xlane.f32.xlu0 %v3706_v10  ;;  %5128 = vmatpush3.bf16.msra.mxu0 %v5125_v46  ;;  %v4274_v10 = vld [vmem:[%s6316_s7 + $0x1c8] sm:$0xff] }
0x1f6d   : > { %v3705_v37 = vadd.f32 %v3703_v3, %v3699_v11  ;;  %5130 = vmatprep.subr.bf16.mxu0 %v5129_v54  ;;  %v4270_v3 = vld [vmem:[%s6316_s7 + $0x1a8] sm:$0xff]  ;;  %v4275_v11 = vld [vmem:[%s6316_s7 + $0x1d0] sm:$0xff] }
0x1f6e   : > { %v5133_v8 = vpack.c.bf16 %v4270_v3, %v4269_v0 }
0x1f6f   : > { %v3709_v13 = vsel %vm353_vm1, %v3705_v37, 0.0 }
0x1f70   : > { %3710 = vadd.xlane.f32.xlu0 %v3709_v13  ;;  %5132 = vmatpush3.bf16.msra.mxu0 %v5129_v54  ;;  %v4276_v13 = vld [vmem:[%s6316_s7 + $0x1d8] sm:$0xff] }
0x1f71   : > { %5134 = vmatprep.subr.bf16.mxu0 %v5133_v8 }
0x1f74   : > { %5136 = vmatpush3.bf16.msra.mxu0 %v5133_v8 }
0x1ff9   : > { %v3708_v14 = vpop.xlane.xlu0 %3707 }
0x1ffa   : > { %v3712_v2 = vmul.f32 0.03125, %v3708_v14  ;;  %v5145_v14 = vpack.c.bf16 %v4276_v13, %v4275_v11  ;;  %v3963_v13 = vrot.slane %v6161_v30, %v5869_v42 }
0x1ffc   : > { %v3714_v39 = vsub.f32 %v3704_v6, %v3712_v2  ;;  %v5137_v6 = vpack.c.bf16 %v4272_v4, %v4271_v12  ;;  %v4277_v2 = vld [vmem:[%s6316_s7 + $0x1e0] sm:$0xff] }
0x1ffd   : > { %v3711_v62 = vpop.xlane.xlu0 %3710 }
0x1ffe   : > { %v3713_v17 = vmul.f32 0.03125, %v3711_v62  ;;  %v3716_v18 = vmul.f32 %v3714_v39, %v3714_v39  ;;  %5138 = vmatprep.subr.bf16.mxu0 %v5137_v6 }
0x1fff   : > { %5140 = vmatpush3.bf16.msra.mxu0 %v5137_v6 }
0x2000   : > { %v3715_v19 = vsub.f32 %v3705_v37, %v3713_v17  ;;  %v3718_v5 = vsel %vm353_vm1, %v3716_v18, 0.0  ;;  %v5141_v37 = vpack.c.bf16 %v4274_v10, %v4273_v9  ;;  %v4279_v17 = vld [vmem:[%s6316_s7 + $0x1f0] sm:$0xff]  ;;  %v4280_v18 = vld [vmem:[%s6316_s7 + $0x1f8] sm:$0xff]  ;;  %v3957_v9 = vrot.slane %v6161_v30, %v5696_v56  ;;  %v5426_v56 = vld [vmem:[%s6314_s5] sm:$0xf] }
0x2001   : > { %3719 = vadd.xlane.f32.xlu0 %v3718_v5  ;;  %v3747_v5 = vrot.slane %v6000_v57, %v2178_v20 }
0x2002   : > { %v3717_v40 = vmul.f32 %v3715_v19, %v3715_v19  ;;  %5142 = vmatprep.subr.bf16.mxu0 %v5141_v37 }
0x2003   : > { %5144 = vmatpush3.bf16.msra.mxu0 %v5141_v37 }
0x2004   : > { %v3721_v21 = vsel %vm353_vm1, %v3717_v40, 0.0  ;;  %5146 = vmatprep.subr.bf16.mxu0 %v5145_v14 }
0x2005   : > { %3722 = vadd.xlane.f32.xlu1 %v3721_v21 }
0x2007   : > { %5148 = vmatpush3.bf16.msra.mxu0 %v5145_v14 }
0x208e   : > { %v3720_v7 = vpop.xlane.xlu0 %3719 }
0x208f   : > { %v3724_v16 = vmul.f32 0.03125, %v3720_v7 }
0x2091   : > { %v3726_v26 = vadd.f32 1e-05, %v3724_v16 }
0x2092   : > { %v3723_v27 = vpop.xlane.xlu1 %3722 }
0x2093   : > { %5414 = vrsqrt.f32 %v3726_v26  ;;  %v3725_v1 = vmul.f32 0.03125, %v3723_v27 }
0x2095   : > { %v3727_v63 = vadd.f32 1e-05, %v3725_v1 }
0x2097   : > { %5416 = vrsqrt.f32 %v3727_v63 }
0x209d   : > { %v5415_v33 = vpop.eup %5414 }
0x209e   : > { %v3730_v15 = vmul.f32 %v5415_v33, %v3714_v39  ;;  %v4278_v39 = vld [vmem:[%s6316_s7 + $0x1e8] sm:$0xff] }
0x209f   : > { %v5149_v62 = vpack.c.bf16 %v4278_v39, %v4277_v2 }
0x20a0   : > { %v3736_v49 = vmul.f32 %v3735_v31, %v3730_v15 }
0x20a1   : > { %v5417_v34 = vpop.eup %5416  ;;  %5150 = vmatprep.subr.bf16.mxu0 %v5149_v62 }
0x20a2   : > { %v3731_v36 = vmul.f32 %v5417_v34, %v3715_v19  ;;  %v6168_v43 = vadd.f32 %v3741_v52, %v3736_v49  ;;  %v5153_v19 = vpack.c.bf16 %v4280_v18, %v4279_v17  ;;  %5152 = vmatpush3.bf16.msra.mxu0 %v5149_v62 }
0x20a4   : > { %v3737_v45 = vmul.f32 %v3735_v31, %v3731_v36  ;;  %4852 = vmatprep.mubr.msk.f32.mxu1 %vm353_vm1, %v6168_v43  ;;  %5154 = vmatprep.subr.bf16.mxu0 %v5153_v19 }
0x20a6   : > { %v6172_v60 = vadd.f32 %v3741_v52, %v3737_v45  ;;  %5156 = vmatpush3.bf16.msra.mxu0 %v5153_v19  ;;  %v3850_v45 = vrot.slane %v6000_v57, %v2281_v59 }
0x20a8   : > { %4853 = vmatmul.mubr.msk.f32.vlgmr.msra.gmra.mrb[22].mxu1 %vm353_vm1, %v6172_v60 }
0x20a9   : > { %5162 = vmatpush3.bf16.xpose.msk.msra.mxu1 %vm6236_vm13, %v5582_v32 }
0x20aa   : > { %5165 = vmatprep.subr.msk.bf16.mxu1 %vm6236_vm13, %v5591_v35 }
0x20b1   : > { %5168 = vmatpush3.bf16.xpose.msk.msra.mxu1 %vm6236_vm13, %v5591_v35 }
0x20b2   : > { %5171 = vmatprep.subr.msk.bf16.mxu1 %vm6236_vm13, %v5602_v38 }
0x20b9   : > { %5174 = vmatpush3.bf16.xpose.msk.msra.mxu1 %vm6236_vm13, %v5602_v38 }
0x20ba   : > { %5177 = vmatprep.subr.msk.bf16.mxu1 %vm6236_vm13, %v5612_v41 }
0x20c1   : > { %5180 = vmatpush3.bf16.xpose.msk.msra.mxu1 %vm6236_vm13, %v5612_v41 }
0x20c2   : > { %5183 = vmatprep.subr.msk.bf16.mxu1 %vm6236_vm13, %v5622_v44 }
0x20c9   : > { %5186 = vmatpush3.bf16.xpose.msk.msra.mxu1 %vm6236_vm13, %v5622_v44 }
0x20ca   : > { %5189 = vmatprep.subr.msk.bf16.mxu1 %vm6236_vm13, %v5632_v47 }
0x20d1   : > { %5192 = vmatpush3.bf16.xpose.msk.msra.mxu1 %vm6236_vm13, %v5632_v47 }
0x20d2   : > { %5195 = vmatprep.subr.msk.bf16.mxu1 %vm6236_vm13, %v5642_v50 }
0x20d9   : > { %5198 = vmatpush3.bf16.xpose.msk.msra.mxu1 %vm6236_vm13, %v5642_v50 }
0x20da   : > { %5201 = vmatprep.subr.msk.bf16.mxu1 %vm6236_vm13, %v5652_v53 }
0x20e1   : > { %5204 = vmatpush3.bf16.xpose.msk.msra.mxu1 %vm6236_vm13, %v5652_v53 }
0x217b   : > { %v4854_v40 = vpop.f32.mrb[22].mxu1 }
0x217c   : > { %v3826_v21 = vadd.f32 %v4854_v40, %v3747_v5  ;;  %v3820_v22 = vpop.f32.mrb[23].mxu1  ;;  %v3969_v40 = vrot.slane %v5426_v56, %v5869_v42 }
0x217d   : > { %v3821_v55 = vadd.f32 %v3820_v22, %v3747_v5 }
0x217e   : > { %v3830_v23 = vmul.f32 %v3826_v21, %v3826_v21 }
0x217f   : > { %v3829_v61 = vmul.f32 %v3821_v55, %v3821_v55 }
0x2180   : > { %v3832_v24 = vmul.f32 %v3830_v23, %v3826_v21 }
0x2181   : > { %v3831_v25 = vmul.f32 %v3829_v61, %v3821_v55 }
0x2182   : > { %v3834_v7 = vmul.f32 0.044715, %v3832_v24 }
0x2183   : > { %v3833_v16 = vmul.f32 0.044715, %v3831_v25 }
0x2184   : > { %v3836_v26 = vadd.f32 %v3834_v7, %v3826_v21 }
0x2185   : > { %v3835_v27 = vadd.f32 %v3833_v16, %v3821_v55 }
0x2186   : > { %v3838_v1 = vmul.f32 0.7978846, %v3836_v26 }
0x2187   : > { %v3837_v63 = vmul.f32 0.7978846, %v3835_v27 }
0x2188   : > { %5418 = vtanh.f32 %v3838_v1 }
0x2189   : > { %5420 = vtanh.f32 %v3837_v63 }
0x2192   : > { %v5419_v31 = vpop.eup %5418 }
0x2193   : > { %v5421_v33 = vpop.eup %5420  ;;  %v3842_v15 = vadd.f32 1.0, %v5419_v31 }
0x2194   : > { %v3841_v20 = vadd.f32 1.0, %v5421_v33 }
0x2195   : > { %v3844_v52 = vmul.f32 0.5, %v3842_v15 }
0x2196   : > { %v3843_v49 = vmul.f32 0.5, %v3841_v20 }
0x2197   : > { %v3846_v36 = vmul.f32 %v3844_v52, %v3826_v21 }
0x2198   : > { %v3845_v34 = vmul.f32 %v3843_v49, %v3821_v55 }
0x219a   : > { %4887 = vmatprep.mubr.f32.mxu0 %v3845_v34 }
0x219b   : > { %4888 = vmatmul.mubr.f32.vlgmr.msra.gmra.mrb[32].mxu0 %v3846_v36 }
0x226e   : > { %v4889_v28 = vpop.f32.mrb[32].mxu0 }
0x226f   : > { %v3923_v51 = vadd.f32 %v4889_v28, %v3850_v45  ;;  %v3917_v46 = vpop.f32.mrb[33].mxu0 }
0x2270   : > { %v3918_v29 = vadd.f32 %v3917_v46, %v3850_v45 }
0x2271   : > { %v3927_v58 = vadd.f32 %v3923_v51, %v6172_v60 }
0x2272   : > { %v3926_v54 = vadd.f32 %v3918_v29, %v6168_v43 }
0x2273   : > { %v3931_v0 = vsel %vm353_vm1, %v3927_v58, 0.0 }
0x2274   : > { %3932 = vadd.xlane.f32.xlu1 %v3931_v0  ;;  %v3928_v3 = vsel %vm353_vm1, %v3926_v54, 0.0 }
0x2275   : > { %3929 = vadd.xlane.f32.xlu0 %v3928_v3 }
0x2301   : > { %v3933_v32 = vpop.xlane.xlu1 %3932 }
0x2302   : > { %v3935_v35 = vmul.f32 0.03125, %v3933_v32  ;;  %v3930_v38 = vpop.xlane.xlu0 %3929 }
0x2303   : > { %v3934_v41 = vmul.f32 0.03125, %v3930_v38 }
0x2304   : > { %v3937_v44 = vsub.f32 %v3927_v58, %v3935_v35 }
0x2305   : > { %v3936_v47 = vsub.f32 %v3926_v54, %v3934_v41 }
0x2306   : > { %v3939_v59 = vmul.f32 %v3937_v44, %v3937_v44 }
0x2307   : > { %v3938_v57 = vmul.f32 %v3936_v47, %v3936_v47 }
0x2308   : > { %v3943_v43 = vsel %vm353_vm1, %v3939_v59, 0.0 }
0x2309   : > { %3944 = vadd.xlane.f32.xlu1 %v3943_v43  ;;  %v3940_v50 = vsel %vm353_vm1, %v3938_v57, 0.0 }
0x230a   : > { %3941 = vadd.xlane.f32.xlu0 %v3940_v50 }
0x2396   : > { %v3945_v60 = vpop.xlane.xlu1 %3944 }
0x2397   : > { %v3947_v8 = vmul.f32 0.03125, %v3945_v60  ;;  %v3942_v12 = vpop.xlane.xlu0 %3941 }
0x2398   : > { %v3946_v4 = vmul.f32 0.03125, %v3942_v12 }
0x2399   : > { %v3949_v6 = vadd.f32 1e-05, %v3947_v8 }
0x239a   : > { %v3948_v53 = vadd.f32 1e-05, %v3946_v4 }
0x239b   : > { %5422 = vrsqrt.f32 %v3949_v6 }
0x239c   : > { %5424 = vrsqrt.f32 %v3948_v53 }
0x23a5   : > { %v5423_v10 = vpop.eup %5422 }
0x23a6   : > { %v5425_v11 = vpop.eup %5424  ;;  %v3953_v37 = vmul.f32 %v5423_v10, %v3937_v44 }
0x23a7   : > { %v3952_v14 = vmul.f32 %v5425_v11, %v3936_v47 }
0x23a8   : > { %v3959_v2 = vmul.f32 %v3957_v9, %v3953_v37 }
0x23a9   : > { %v3958_v39 = vmul.f32 %v3957_v9, %v3952_v14 }
0x23aa   : > { %v3965_v62 = vadd.f32 %v3963_v13, %v3959_v2 }
0x23ab   : > { %v3964_v17 = vadd.f32 %v3963_v13, %v3958_v39 }
0x23ac   : > { %v3973_v18 = vrot.slane %v3965_v62, 4 }
0x23ad   : > { %v3972_v19 = vrot.slane %v3964_v17, 4 }
0x23af   : > { %v3974_v5 = vsel %vm770_vm7, %v3972_v19, %v3973_v18 }
0x23b0   : > { %4922 = vmatprep.mubr.msk.f32.mxu1 %vm353_vm1, %v3974_v5 }
0x23b1   : > { %4923 = vmatmul.mubr.msk.f32.vlgmr.msra.gmra.mrb[24].mxu1 %vm353_vm1, %v3973_v18 }
0x2484   : > { %v4924_v30 = vpop.f32.mrb[24].mxu1 }
0x2485   : > { %v4099_v21 = vadd.f32 %v4924_v30, %v3969_v40  ;;  %v4093_v22 = vpop.f32.mrb[25].mxu1 }
0x2486   : > { %v4094_v55 = vadd.f32 %v4093_v22, %v3969_v40 }
0x2487   : > { %4103 = vst [vmem:[%s346_s26 + $0x8] sm:$0xf] %v4099_v21 }
0x2488   : > { %4102 = vst [vmem:[%s346_s26] sm:$0xff] %v4094_v55 }
0x2489 PF: > { %s19_s30 = sadd.s32 1, %s5433_s30  }
0x248a   : > { %p16_p4 = scmp.ge.s32.totalorder %s19_s30, 4  }
0x248c   :  { %18 = sbr.rel (!%p16_p4) target bundleno = 1 (0x1), region = 99 }

</bundles_post_ra>
